<compile_context>
chip_gen: v5e
topology: v5e:2x2
jax: 0.10.0
libtpu: 0.0.40
codegen_flags: <defaults>
</compile_context>

<pallas_src>
import math

import jax
import jax.numpy as jnp
from jax import lax
from jax.experimental import pallas as pl
from jax.experimental.pallas import tpu as pltpu

# Small, TPU-tile-friendly hyperparameters.
B, N, W, D, H = 2, 4, 8, 128, 4       # batch, nodes, max_words, embedding_dim, heads
DH = D // H                           # per-head dim
BN = B * N                            # nodes across the whole batch
T = BN * W                            # stacked word rows (sublane axis)
VOCAB = 64
PAD = 0                               # padding_idx
NEG_INF = -1e9
LN_EPS = 1e-5


def em_graph_kernel(emb_ref, pe_ref, bias_ref, wq_ref, wk_ref, wv_ref, wo_ref,
                    gamma_ref, beta_ref, wlin_ref, out_ref):
    # Whole problem in one grid step. Activations are [T, D] = [64, 128] with
    # word-major stacking: row t = w*BN + n  (word w, flattened node n = b*N + node).
    x = emb_ref[...] + pe_ref[...]                      # [T, D] f32, add positional enc
    xb = x.astype(jnp.bfloat16)

    # Fused QKV projections: three [T,128] @ [128,128] bf16 matmuls, f32 accumulate.
    q = jnp.dot(xb, wq_ref[...], preferred_element_type=jnp.float32)   # [T, D]
    k = jnp.dot(xb, wk_ref[...], preferred_element_type=jnp.float32)   # [T, D]
    v = jnp.dot(xb, wv_ref[...], preferred_element_type=jnp.float32)   # [T, D]

    bias = bias_ref[...]                                # [T, T] additive mask
    scale = 1.0 / math.sqrt(DH)

    ctx_parts = []
    for h in range(H):                                  # static unroll over heads
        lo = h * DH
        qh = q[:, lo:lo + DH]                           # [T, DH]
        kh = k[:, lo:lo + DH]
        vh = v[:, lo:lo + DH]
        s = lax.dot_general(qh, kh, (((1,), (1,)), ((), ())),
                            preferred_element_type=jnp.float32)        # [T, T]
        s = s * scale + bias                            # block-diag + key-pad mask
        s = s - jnp.max(s, axis=-1, keepdims=True)
        p = jnp.exp(s)
        p = p * pl.reciprocal(jnp.sum(p, axis=-1, keepdims=True), approx=True)
        ctx_parts.append(jnp.dot(p, vh, preferred_element_type=jnp.float32))
    ctx = jnp.concatenate(ctx_parts, axis=-1)           # [T, D]

    # Output projection (one [T,128]@[128,128]), residual + LayerNorm.
    o = jnp.dot(ctx.astype(jnp.bfloat16), wo_ref[...],
                preferred_element_type=jnp.float32)     # [T, D]
    y = o + x
    mu = jnp.mean(y, axis=-1, keepdims=True)
    var = jnp.mean((y - mu) ** 2, axis=-1, keepdims=True)
    yn = (y - mu) * lax.rsqrt(var + LN_EPS)
    yn = yn * gamma_ref[...] + beta_ref[...]            # [T, D]

    # Final Linear(W*D -> D, bias=False). With word-major rows this is
    #   out[n, :] = sum_w  yn[w*BN + n, :] @ Wlin[w]
    # i.e. 8 vreg-aligned [BN,128] @ [128,128] matmuls.
    acc = jnp.zeros((BN, D), jnp.float32)
    for w in range(W):                                  # static unroll over words
        lhs = yn[w * BN:(w + 1) * BN, :].astype(jnp.bfloat16)
        acc = acc + jnp.dot(lhs, wlin_ref[w], preferred_element_type=jnp.float32)
    out_ref[...] = acc                                  # [BN, D]


def em_graph_forward(tokens, emb_table, pe, wq3, wk3, wv3, wo3, gamma, beta, wlin3):
    # Glue: embedding gather, word-major layout, fused weight views, bf16 casts and
    # the additive attention bias.  All heavy compute happens inside the kernel.
    # TODO(synk): embedding gather could be folded into the kernel via scalar prefetch.
    emb = jnp.take(emb_table, tokens, axis=0)                           # [B,N,W,D]
    emb_t = emb.reshape(BN, W, D).transpose(1, 0, 2).reshape(T, D)      # word-major
    pe_t = jnp.repeat(pe, BN, axis=0)                                   # row t -> pe[t // BN]

    # Additive attention bias: 0 where (same node) and (key token != PAD), else -1e9.
    tok_flat = tokens.reshape(BN, W).T.reshape(T)                       # token of row t
    node_id = jnp.arange(T, dtype=jnp.int32) % BN
    same_node = node_id[:, None] == node_id[None, :]
    valid = same_node & (tok_flat != PAD)[None, :]
    bias = jnp.where(valid, 0.0, NEG_INF).astype(jnp.float32)           # [T, T]

    # Fused per-head weights -> full 128-wide matmul operands, cast to bf16.
    wq_f = jnp.transpose(wq3, (1, 0, 2)).reshape(D, D).astype(jnp.bfloat16)
    wk_f = jnp.transpose(wk3, (1, 0, 2)).reshape(D, D).astype(jnp.bfloat16)
    wv_f = jnp.transpose(wv3, (1, 0, 2)).reshape(D, D).astype(jnp.bfloat16)
    wo_f = wo3.reshape(D, D).astype(jnp.bfloat16)
    wlin_b = wlin3.astype(jnp.bfloat16)                                 # [W, D, D]

    out = pl.pallas_call(
        em_graph_kernel,
        out_shape=jax.ShapeDtypeStruct((BN, D), jnp.float32),
        grid_spec=pltpu.PrefetchScalarGridSpec(
            num_scalar_prefetch=0,
            grid=(1,),
            in_specs=[
                pl.BlockSpec((T, D), lambda i: (0, 0)),        # embeddings (word-major)
                pl.BlockSpec((T, D), lambda i: (0, 0)),        # positional encoding
                pl.BlockSpec((T, T), lambda i: (0, 0)),        # additive attention bias
                pl.BlockSpec((D, D), lambda i: (0, 0)),        # Wq fused
                pl.BlockSpec((D, D), lambda i: (0, 0)),        # Wk fused
                pl.BlockSpec((D, D), lambda i: (0, 0)),        # Wv fused
                pl.BlockSpec((D, D), lambda i: (0, 0)),        # Wo fused
                pl.BlockSpec((1, D), lambda i: (0, 0)),        # LN gamma
                pl.BlockSpec((1, D), lambda i: (0, 0)),        # LN beta
                pl.BlockSpec((W, D, D), lambda i: (0, 0, 0)),  # final linear [W, D, D]
            ],
            out_specs=pl.BlockSpec((BN, D), lambda i: (0, 0)),
        ),
        compiler_params=pltpu.CompilerParams(
            dimension_semantics=("arbitrary",)),
    )(emb_t, pe_t, bias, wq_f, wk_f, wv_f, wo_f, gamma, beta, wlin_b)
    return out.reshape(B, N, D)                                         # [B, N, D]


def em_graph_reference(tokens, emb_table, pe, wq3, wk3, wv3, wo3, gamma, beta, wlin3):
    # Pure-JAX f32 reference with identical semantics.
    x = jnp.take(emb_table, tokens, axis=0) + pe                        # [B,N,W,D]
    q = jnp.einsum('bnwd,hde->bnhwe', x, wq3)
    k = jnp.einsum('bnwd,hde->bnhwe', x, wk3)
    v = jnp.einsum('bnwd,hde->bnhwe', x, wv3)
    s = jnp.einsum('bnhwe,bnhke->bnhwk', q, k) / math.sqrt(DH)
    pad = (tokens == PAD)[:, :, None, None, :]
    s = jnp.where(pad, NEG_INF, s)
    p = jax.nn.softmax(s, axis=-1)
    ctx = jnp.einsum('bnhwk,bnhke->bnhwe', p, v)
    o = jnp.einsum('bnhwe,hed->bnwd', ctx, wo3)
    y = o + x
    mu = jnp.mean(y, axis=-1, keepdims=True)
    var = jnp.mean((y - mu) ** 2, axis=-1, keepdims=True)
    yn = (y - mu) / jnp.sqrt(var + LN_EPS) * gamma[0] + beta[0]
    flat = yn.reshape(B, N, W * D)
    return flat @ wlin3.reshape(W * D, D)


def make_params(key):
    k_tok, k_emb, k_q, k_k, k_v, k_o, k_lin = jax.random.split(key, 7)
    tokens = jax.random.randint(k_tok, (B, N, W), 0, VOCAB, dtype=jnp.int32)

    # nn.Embedding(src_vocab_size, D, padding_idx): normal(0, D^-0.5), pad row zero.
    emb_table = jax.random.normal(k_emb, (VOCAB, D), jnp.float32) * (D ** -0.5)
    emb_table = emb_table.at[PAD].set(0.0)

    # Sinusoidal positional encoding over the word axis (dropout skipped: eval mode).
    pos = jnp.arange(W, dtype=jnp.float32)[:, None]
    div = jnp.exp(jnp.arange(0, D, 2, dtype=jnp.float32) * (-math.log(10000.0) / D))
    pe = jnp.zeros((W, D), jnp.float32)
    pe = pe.at[:, 0::2].set(jnp.sin(pos * div))
    pe = pe.at[:, 1::2].set(jnp.cos(pos * div))

    sc = D ** -0.5
    wq3 = jax.random.normal(k_q, (H, D, DH), jnp.float32) * sc
    wk3 = jax.random.normal(k_k, (H, D, DH), jnp.float32) * sc
    wv3 = jax.random.normal(k_v, (H, D, DH), jnp.float32) * sc
    wo3 = jax.random.normal(k_o, (H, DH, D), jnp.float32) * sc
    gamma = jnp.ones((1, D), jnp.float32)
    beta = jnp.zeros((1, D), jnp.float32)
    # nn.Linear(D * max_words, D, bias=False) stored as [W*D, D] -> [W, D, D].
    wlin3 = jax.random.normal(k_lin, (W, D, D), jnp.float32) * ((W * D) ** -0.5)
    return tokens, emb_table, pe, wq3, wk3, wv3, wo3, gamma, beta, wlin3


if __name__ == "__main__":
    params = make_params(jax.random.PRNGKey(0))
    out = jax.block_until_ready(em_graph_forward(*params))
    ref = em_graph_reference(*params)

    assert out.shape == (B, N, D), out.shape
    assert bool(jnp.all(jnp.isfinite(out)))
    max_err = float(jnp.max(jnp.abs(out - ref)))
    assert jnp.allclose(out, ref, atol=5e-2, rtol=5e-2), f"max abs err {max_err}"
    print("KERNEL_OK")
</pallas_src>

<mosaic_0001>
module attributes {stable_mosaic.version = 11 : i64} {
  func.func @em_graph_kernel(%arg0: i32, %arg1: memref<64x128xf32, #tpu.memory_space<vmem>>, %arg2: memref<64x128xf32, #tpu.memory_space<vmem>>, %arg3: memref<64x64xf32, #tpu.memory_space<vmem>>, %arg4: memref<128x128xbf16, #tpu.memory_space<vmem>>, %arg5: memref<128x128xbf16, #tpu.memory_space<vmem>>, %arg6: memref<128x128xbf16, #tpu.memory_space<vmem>>, %arg7: memref<128x128xbf16, #tpu.memory_space<vmem>>, %arg8: memref<1x128xf32, #tpu.memory_space<vmem>>, %arg9: memref<1x128xf32, #tpu.memory_space<vmem>>, %arg10: memref<8x128x128xbf16, #tpu.memory_space<vmem>>, %arg11: memref<8x128xf32, #tpu.memory_space<vmem>>) attributes {dimension_semantics = [#tpu.dimension_semantics<arbitrary>], iteration_bounds = array<i64: 1>, scalar_prefetch = 0 : i64, scratch_operands = 0 : i64, tpu.core_type = #tpu.core_type<tc>, window_params = [{pipeline_mode = #tpu.pipeline_mode<synchronous>, transform_indices = @transform_0, window_bounds = array<i64: 64, 128>}, {pipeline_mode = #tpu.pipeline_mode<synchronous>, transform_indices = @transform_1, window_bounds = array<i64: 64, 128>}, {pipeline_mode = #tpu.pipeline_mode<synchronous>, transform_indices = @transform_2, window_bounds = array<i64: 64, 64>}, {pipeline_mode = #tpu.pipeline_mode<synchronous>, transform_indices = @transform_3, window_bounds = array<i64: 128, 128>}, {pipeline_mode = #tpu.pipeline_mode<synchronous>, transform_indices = @transform_4, window_bounds = array<i64: 128, 128>}, {pipeline_mode = #tpu.pipeline_mode<synchronous>, transform_indices = @transform_5, window_bounds = array<i64: 128, 128>}, {pipeline_mode = #tpu.pipeline_mode<synchronous>, transform_indices = @transform_6, window_bounds = array<i64: 128, 128>}, {pipeline_mode = #tpu.pipeline_mode<synchronous>, transform_indices = @transform_7, window_bounds = array<i64: 1, 128>}, {pipeline_mode = #tpu.pipeline_mode<synchronous>, transform_indices = @transform_8, window_bounds = array<i64: 1, 128>}, {pipeline_mode = #tpu.pipeline_mode<synchronous>, transform_indices = @transform_9, window_bounds = array<i64: 8, 128, 128>}, {pipeline_mode = #tpu.pipeline_mode<synchronous>, transform_indices = @transform_10, window_bounds = array<i64: 8, 128>}]} {
    %c0 = arith.constant 0 : index
    %c0_0 = arith.constant 0 : index
    %0 = vector.load %arg1[%c0, %c0_0] : memref<64x128xf32, #tpu.memory_space<vmem>>, vector<64x128xf32>
    %c0_1 = arith.constant 0 : index
    %c0_2 = arith.constant 0 : index
    %1 = vector.load %arg2[%c0_1, %c0_2] : memref<64x128xf32, #tpu.memory_space<vmem>>, vector<64x128xf32>
    %2 = arith.addf %0, %1 : vector<64x128xf32>
    %3 = arith.truncf %2 : vector<64x128xf32> to vector<64x128xbf16>
    %c0_3 = arith.constant 0 : index
    %c0_4 = arith.constant 0 : index
    %4 = vector.load %arg4[%c0_3, %c0_4] : memref<128x128xbf16, #tpu.memory_space<vmem>>, vector<128x128xbf16>
    %cst = arith.constant dense<0.000000e+00> : vector<64x128xf32>
    %5 = tpu.matmul %3, %4, %cst {dimension_numbers = #tpu.dot_dimension_numbers<[1], [0], [0], [1], [0, 0, 1, 1], [], []>} : vector<64x128xbf16>, vector<128x128xbf16>, vector<64x128xf32> -> vector<64x128xf32>
    %c0_5 = arith.constant 0 : index
    %c0_6 = arith.constant 0 : index
    %6 = vector.load %arg5[%c0_5, %c0_6] : memref<128x128xbf16, #tpu.memory_space<vmem>>, vector<128x128xbf16>
    %cst_7 = arith.constant dense<0.000000e+00> : vector<64x128xf32>
    %7 = tpu.matmul %3, %6, %cst_7 {dimension_numbers = #tpu.dot_dimension_numbers<[1], [0], [0], [1], [0, 0, 1, 1], [], []>} : vector<64x128xbf16>, vector<128x128xbf16>, vector<64x128xf32> -> vector<64x128xf32>
    %c0_8 = arith.constant 0 : index
    %c0_9 = arith.constant 0 : index
    %8 = vector.load %arg6[%c0_8, %c0_9] : memref<128x128xbf16, #tpu.memory_space<vmem>>, vector<128x128xbf16>
    %cst_10 = arith.constant dense<0.000000e+00> : vector<64x128xf32>
    %9 = tpu.matmul %3, %8, %cst_10 {dimension_numbers = #tpu.dot_dimension_numbers<[1], [0], [0], [1], [0, 0, 1, 1], [], []>} : vector<64x128xbf16>, vector<128x128xbf16>, vector<64x128xf32> -> vector<64x128xf32>
    %c0_11 = arith.constant 0 : index
    %c0_12 = arith.constant 0 : index
    %10 = vector.load %arg3[%c0_11, %c0_12] : memref<64x64xf32, #tpu.memory_space<vmem>>, vector<64x64xf32>
    %11 = vector.extract_strided_slice %5 {offsets = [0, 0], sizes = [64, 32], strides = [1, 1]} : vector<64x128xf32> to vector<64x32xf32>
    %12 = vector.extract_strided_slice %7 {offsets = [0, 0], sizes = [64, 32], strides = [1, 1]} : vector<64x128xf32> to vector<64x32xf32>
    %13 = vector.extract_strided_slice %9 {offsets = [0, 0], sizes = [64, 32], strides = [1, 1]} : vector<64x128xf32> to vector<64x32xf32>
    %cst_13 = arith.constant dense<0.000000e+00> : vector<64x64xf32>
    %14 = tpu.matmul %11, %12, %cst_13 {dimension_numbers = #tpu.dot_dimension_numbers<[1], [1], [0], [0], [0, 0, 1, 0], [], []>} : vector<64x32xf32>, vector<64x32xf32>, vector<64x64xf32> -> vector<64x64xf32>
    %cst_14 = arith.constant 0.176776692 : f32
    %15 = vector.broadcast %cst_14 : f32 to vector<64x64xf32>
    %16 = arith.mulf %14, %15 : vector<64x64xf32>
    %17 = arith.addf %16, %10 : vector<64x64xf32>
    %cst_15 = arith.constant dense<0xFF800000> : vector<64xf32>
    %18 = vector.multi_reduction <maximumf>, %17, %cst_15 [1] : vector<64x64xf32> to vector<64xf32>
    %19 = vector.shape_cast %18 : vector<64xf32> to vector<64x1xf32>
    %20 = vector.broadcast %19 : vector<64x1xf32> to vector<64x64xf32>
    %21 = arith.subf %17, %20 : vector<64x64xf32>
    %22 = math.exp %21 : vector<64x64xf32>
    %cst_16 = arith.constant dense<0.000000e+00> : vector<64xf32>
    %23 = vector.multi_reduction <add>, %22, %cst_16 [1] : vector<64x64xf32> to vector<64xf32>
    %24 = vector.shape_cast %23 : vector<64xf32> to vector<64x1xf32>
    %25 = tpu.reciprocal %24 {approx = true} : vector<64x1xf32> -> vector<64x1xf32>
    %26 = vector.broadcast %25 : vector<64x1xf32> to vector<64x64xf32>
    %27 = arith.mulf %22, %26 : vector<64x64xf32>
    %cst_17 = arith.constant dense<0.000000e+00> : vector<64x32xf32>
    %28 = tpu.matmul %27, %13, %cst_17 {dimension_numbers = #tpu.dot_dimension_numbers<[1], [0], [0], [1], [0, 0, 1, 1], [], []>} : vector<64x64xf32>, vector<64x32xf32>, vector<64x32xf32> -> vector<64x32xf32>
    %29 = vector.extract_strided_slice %5 {offsets = [0, 32], sizes = [64, 32], strides = [1, 1]} : vector<64x128xf32> to vector<64x32xf32>
    %30 = vector.extract_strided_slice %7 {offsets = [0, 32], sizes = [64, 32], strides = [1, 1]} : vector<64x128xf32> to vector<64x32xf32>
    %31 = vector.extract_strided_slice %9 {offsets = [0, 32], sizes = [64, 32], strides = [1, 1]} : vector<64x128xf32> to vector<64x32xf32>
    %cst_18 = arith.constant dense<0.000000e+00> : vector<64x64xf32>
    %32 = tpu.matmul %29, %30, %cst_18 {dimension_numbers = #tpu.dot_dimension_numbers<[1], [1], [0], [0], [0, 0, 1, 0], [], []>} : vector<64x32xf32>, vector<64x32xf32>, vector<64x64xf32> -> vector<64x64xf32>
    %cst_19 = arith.constant 0.176776692 : f32
    %33 = vector.broadcast %cst_19 : f32 to vector<64x64xf32>
    %34 = arith.mulf %32, %33 : vector<64x64xf32>
    %35 = arith.addf %34, %10 : vector<64x64xf32>
    %cst_20 = arith.constant dense<0xFF800000> : vector<64xf32>
    %36 = vector.multi_reduction <maximumf>, %35, %cst_20 [1] : vector<64x64xf32> to vector<64xf32>
    %37 = vector.shape_cast %36 : vector<64xf32> to vector<64x1xf32>
    %38 = vector.broadcast %37 : vector<64x1xf32> to vector<64x64xf32>
    %39 = arith.subf %35, %38 : vector<64x64xf32>
    %40 = math.exp %39 : vector<64x64xf32>
    %cst_21 = arith.constant dense<0.000000e+00> : vector<64xf32>
    %41 = vector.multi_reduction <add>, %40, %cst_21 [1] : vector<64x64xf32> to vector<64xf32>
    %42 = vector.shape_cast %41 : vector<64xf32> to vector<64x1xf32>
    %43 = tpu.reciprocal %42 {approx = true} : vector<64x1xf32> -> vector<64x1xf32>
    %44 = vector.broadcast %43 : vector<64x1xf32> to vector<64x64xf32>
    %45 = arith.mulf %40, %44 : vector<64x64xf32>
    %cst_22 = arith.constant dense<0.000000e+00> : vector<64x32xf32>
    %46 = tpu.matmul %45, %31, %cst_22 {dimension_numbers = #tpu.dot_dimension_numbers<[1], [0], [0], [1], [0, 0, 1, 1], [], []>} : vector<64x64xf32>, vector<64x32xf32>, vector<64x32xf32> -> vector<64x32xf32>
    %47 = vector.extract_strided_slice %5 {offsets = [0, 64], sizes = [64, 32], strides = [1, 1]} : vector<64x128xf32> to vector<64x32xf32>
    %48 = vector.extract_strided_slice %7 {offsets = [0, 64], sizes = [64, 32], strides = [1, 1]} : vector<64x128xf32> to vector<64x32xf32>
    %49 = vector.extract_strided_slice %9 {offsets = [0, 64], sizes = [64, 32], strides = [1, 1]} : vector<64x128xf32> to vector<64x32xf32>
    %cst_23 = arith.constant dense<0.000000e+00> : vector<64x64xf32>
    %50 = tpu.matmul %47, %48, %cst_23 {dimension_numbers = #tpu.dot_dimension_numbers<[1], [1], [0], [0], [0, 0, 1, 0], [], []>} : vector<64x32xf32>, vector<64x32xf32>, vector<64x64xf32> -> vector<64x64xf32>
    %cst_24 = arith.constant 0.176776692 : f32
    %51 = vector.broadcast %cst_24 : f32 to vector<64x64xf32>
    %52 = arith.mulf %50, %51 : vector<64x64xf32>
    %53 = arith.addf %52, %10 : vector<64x64xf32>
    %cst_25 = arith.constant dense<0xFF800000> : vector<64xf32>
    %54 = vector.multi_reduction <maximumf>, %53, %cst_25 [1] : vector<64x64xf32> to vector<64xf32>
    %55 = vector.shape_cast %54 : vector<64xf32> to vector<64x1xf32>
    %56 = vector.broadcast %55 : vector<64x1xf32> to vector<64x64xf32>
    %57 = arith.subf %53, %56 : vector<64x64xf32>
    %58 = math.exp %57 : vector<64x64xf32>
    %cst_26 = arith.constant dense<0.000000e+00> : vector<64xf32>
    %59 = vector.multi_reduction <add>, %58, %cst_26 [1] : vector<64x64xf32> to vector<64xf32>
    %60 = vector.shape_cast %59 : vector<64xf32> to vector<64x1xf32>
    %61 = tpu.reciprocal %60 {approx = true} : vector<64x1xf32> -> vector<64x1xf32>
    %62 = vector.broadcast %61 : vector<64x1xf32> to vector<64x64xf32>
    %63 = arith.mulf %58, %62 : vector<64x64xf32>
    %cst_27 = arith.constant dense<0.000000e+00> : vector<64x32xf32>
    %64 = tpu.matmul %63, %49, %cst_27 {dimension_numbers = #tpu.dot_dimension_numbers<[1], [0], [0], [1], [0, 0, 1, 1], [], []>} : vector<64x64xf32>, vector<64x32xf32>, vector<64x32xf32> -> vector<64x32xf32>
    %65 = vector.extract_strided_slice %5 {offsets = [0, 96], sizes = [64, 32], strides = [1, 1]} : vector<64x128xf32> to vector<64x32xf32>
    %66 = vector.extract_strided_slice %7 {offsets = [0, 96], sizes = [64, 32], strides = [1, 1]} : vector<64x128xf32> to vector<64x32xf32>
    %67 = vector.extract_strided_slice %9 {offsets = [0, 96], sizes = [64, 32], strides = [1, 1]} : vector<64x128xf32> to vector<64x32xf32>
    %cst_28 = arith.constant dense<0.000000e+00> : vector<64x64xf32>
    %68 = tpu.matmul %65, %66, %cst_28 {dimension_numbers = #tpu.dot_dimension_numbers<[1], [1], [0], [0], [0, 0, 1, 0], [], []>} : vector<64x32xf32>, vector<64x32xf32>, vector<64x64xf32> -> vector<64x64xf32>
    %cst_29 = arith.constant 0.176776692 : f32
    %69 = vector.broadcast %cst_29 : f32 to vector<64x64xf32>
    %70 = arith.mulf %68, %69 : vector<64x64xf32>
    %71 = arith.addf %70, %10 : vector<64x64xf32>
    %cst_30 = arith.constant dense<0xFF800000> : vector<64xf32>
    %72 = vector.multi_reduction <maximumf>, %71, %cst_30 [1] : vector<64x64xf32> to vector<64xf32>
    %73 = vector.shape_cast %72 : vector<64xf32> to vector<64x1xf32>
    %74 = vector.broadcast %73 : vector<64x1xf32> to vector<64x64xf32>
    %75 = arith.subf %71, %74 : vector<64x64xf32>
    %76 = math.exp %75 : vector<64x64xf32>
    %cst_31 = arith.constant dense<0.000000e+00> : vector<64xf32>
    %77 = vector.multi_reduction <add>, %76, %cst_31 [1] : vector<64x64xf32> to vector<64xf32>
    %78 = vector.shape_cast %77 : vector<64xf32> to vector<64x1xf32>
    %79 = tpu.reciprocal %78 {approx = true} : vector<64x1xf32> -> vector<64x1xf32>
    %80 = vector.broadcast %79 : vector<64x1xf32> to vector<64x64xf32>
    %81 = arith.mulf %76, %80 : vector<64x64xf32>
    %cst_32 = arith.constant dense<0.000000e+00> : vector<64x32xf32>
    %82 = tpu.matmul %81, %67, %cst_32 {dimension_numbers = #tpu.dot_dimension_numbers<[1], [0], [0], [1], [0, 0, 1, 1], [], []>} : vector<64x64xf32>, vector<64x32xf32>, vector<64x32xf32> -> vector<64x32xf32>
    %83 = tpu.concatenate %28, %46, %64, %82 in 1 : vector<64x32xf32>, vector<64x32xf32>, vector<64x32xf32>, vector<64x32xf32> -> vector<64x128xf32>
    %84 = arith.truncf %83 : vector<64x128xf32> to vector<64x128xbf16>
    %c0_33 = arith.constant 0 : index
    %c0_34 = arith.constant 0 : index
    %85 = vector.load %arg7[%c0_33, %c0_34] : memref<128x128xbf16, #tpu.memory_space<vmem>>, vector<128x128xbf16>
    %cst_35 = arith.constant dense<0.000000e+00> : vector<64x128xf32>
    %86 = tpu.matmul %84, %85, %cst_35 {dimension_numbers = #tpu.dot_dimension_numbers<[1], [0], [0], [1], [0, 0, 1, 1], [], []>} : vector<64x128xbf16>, vector<128x128xbf16>, vector<64x128xf32> -> vector<64x128xf32>
    %87 = arith.addf %86, %2 : vector<64x128xf32>
    %cst_36 = arith.constant dense<0.000000e+00> : vector<64xf32>
    %88 = vector.multi_reduction <add>, %87, %cst_36 [1] : vector<64x128xf32> to vector<64xf32>
    %89 = vector.shape_cast %88 : vector<64xf32> to vector<64x1xf32>
    %cst_37 = arith.constant 1.280000e+02 : f32
    %90 = vector.broadcast %cst_37 : f32 to vector<64x1xf32>
    %91 = arith.divf %89, %90 : vector<64x1xf32>
    %92 = vector.broadcast %91 : vector<64x1xf32> to vector<64x128xf32>
    %93 = arith.subf %87, %92 : vector<64x128xf32>
    %94 = arith.mulf %93, %93 : vector<64x128xf32>
    %cst_38 = arith.constant dense<0.000000e+00> : vector<64xf32>
    %95 = vector.multi_reduction <add>, %94, %cst_38 [1] : vector<64x128xf32> to vector<64xf32>
    %96 = vector.shape_cast %95 : vector<64xf32> to vector<64x1xf32>
    %cst_39 = arith.constant 1.280000e+02 : f32
    %97 = vector.broadcast %cst_39 : f32 to vector<64x1xf32>
    %98 = arith.divf %96, %97 : vector<64x1xf32>
    %99 = vector.broadcast %91 : vector<64x1xf32> to vector<64x128xf32>
    %100 = arith.subf %87, %99 : vector<64x128xf32>
    %cst_40 = arith.constant 9.99999974E-6 : f32
    %101 = vector.broadcast %cst_40 : f32 to vector<64x1xf32>
    %102 = arith.addf %98, %101 : vector<64x1xf32>
    %103 = math.rsqrt %102 : vector<64x1xf32>
    %104 = vector.broadcast %103 : vector<64x1xf32> to vector<64x128xf32>
    %105 = arith.mulf %100, %104 : vector<64x128xf32>
    %c0_41 = arith.constant 0 : index
    %c0_42 = arith.constant 0 : index
    %106 = vector.load %arg8[%c0_41, %c0_42] : memref<1x128xf32, #tpu.memory_space<vmem>>, vector<1x128xf32>
    %107 = vector.broadcast %106 : vector<1x128xf32> to vector<64x128xf32>
    %108 = arith.mulf %105, %107 : vector<64x128xf32>
    %c0_43 = arith.constant 0 : index
    %c0_44 = arith.constant 0 : index
    %109 = vector.load %arg9[%c0_43, %c0_44] : memref<1x128xf32, #tpu.memory_space<vmem>>, vector<1x128xf32>
    %110 = vector.broadcast %109 : vector<1x128xf32> to vector<64x128xf32>
    %111 = arith.addf %108, %110 : vector<64x128xf32>
    %cst_45 = arith.constant 0.000000e+00 : f32
    %112 = vector.broadcast %cst_45 : f32 to vector<8x128xf32>
    %113 = vector.extract_strided_slice %111 {offsets = [0, 0], sizes = [8, 128], strides = [1, 1]} : vector<64x128xf32> to vector<8x128xf32>
    %114 = arith.truncf %113 : vector<8x128xf32> to vector<8x128xbf16>
    %c0_46 = arith.constant 0 : index
    %c0_47 = arith.constant 0 : index
    %c0_48 = arith.constant 0 : index
    %115 = vector.load %arg10[%c0_46, %c0_47, %c0_48] : memref<8x128x128xbf16, #tpu.memory_space<vmem>>, vector<1x128x128xbf16>
    %116 = vector.shape_cast %115 : vector<1x128x128xbf16> to vector<128x128xbf16>
    %cst_49 = arith.constant dense<0.000000e+00> : vector<8x128xf32>
    %117 = tpu.matmul %114, %116, %cst_49 {dimension_numbers = #tpu.dot_dimension_numbers<[1], [0], [0], [1], [0, 0, 1, 1], [], []>} : vector<8x128xbf16>, vector<128x128xbf16>, vector<8x128xf32> -> vector<8x128xf32>
    %118 = arith.addf %112, %117 : vector<8x128xf32>
    %119 = vector.extract_strided_slice %111 {offsets = [8, 0], sizes = [8, 128], strides = [1, 1]} : vector<64x128xf32> to vector<8x128xf32>
    %120 = arith.truncf %119 : vector<8x128xf32> to vector<8x128xbf16>
    %c1 = arith.constant 1 : index
    %c0_50 = arith.constant 0 : index
    %c0_51 = arith.constant 0 : index
    %121 = vector.load %arg10[%c1, %c0_50, %c0_51] : memref<8x128x128xbf16, #tpu.memory_space<vmem>>, vector<1x128x128xbf16>
    %122 = vector.shape_cast %121 : vector<1x128x128xbf16> to vector<128x128xbf16>
    %cst_52 = arith.constant dense<0.000000e+00> : vector<8x128xf32>
    %123 = tpu.matmul %120, %122, %cst_52 {dimension_numbers = #tpu.dot_dimension_numbers<[1], [0], [0], [1], [0, 0, 1, 1], [], []>} : vector<8x128xbf16>, vector<128x128xbf16>, vector<8x128xf32> -> vector<8x128xf32>
    %124 = arith.addf %118, %123 : vector<8x128xf32>
    %125 = vector.extract_strided_slice %111 {offsets = [16, 0], sizes = [8, 128], strides = [1, 1]} : vector<64x128xf32> to vector<8x128xf32>
    %126 = arith.truncf %125 : vector<8x128xf32> to vector<8x128xbf16>
    %c2 = arith.constant 2 : index
    %c0_53 = arith.constant 0 : index
    %c0_54 = arith.constant 0 : index
    %127 = vector.load %arg10[%c2, %c0_53, %c0_54] : memref<8x128x128xbf16, #tpu.memory_space<vmem>>, vector<1x128x128xbf16>
    %128 = vector.shape_cast %127 : vector<1x128x128xbf16> to vector<128x128xbf16>
    %cst_55 = arith.constant dense<0.000000e+00> : vector<8x128xf32>
    %129 = tpu.matmul %126, %128, %cst_55 {dimension_numbers = #tpu.dot_dimension_numbers<[1], [0], [0], [1], [0, 0, 1, 1], [], []>} : vector<8x128xbf16>, vector<128x128xbf16>, vector<8x128xf32> -> vector<8x128xf32>
    %130 = arith.addf %124, %129 : vector<8x128xf32>
    %131 = vector.extract_strided_slice %111 {offsets = [24, 0], sizes = [8, 128], strides = [1, 1]} : vector<64x128xf32> to vector<8x128xf32>
    %132 = arith.truncf %131 : vector<8x128xf32> to vector<8x128xbf16>
    %c3 = arith.constant 3 : index
    %c0_56 = arith.constant 0 : index
    %c0_57 = arith.constant 0 : index
    %133 = vector.load %arg10[%c3, %c0_56, %c0_57] : memref<8x128x128xbf16, #tpu.memory_space<vmem>>, vector<1x128x128xbf16>
    %134 = vector.shape_cast %133 : vector<1x128x128xbf16> to vector<128x128xbf16>
    %cst_58 = arith.constant dense<0.000000e+00> : vector<8x128xf32>
    %135 = tpu.matmul %132, %134, %cst_58 {dimension_numbers = #tpu.dot_dimension_numbers<[1], [0], [0], [1], [0, 0, 1, 1], [], []>} : vector<8x128xbf16>, vector<128x128xbf16>, vector<8x128xf32> -> vector<8x128xf32>
    %136 = arith.addf %130, %135 : vector<8x128xf32>
    %137 = vector.extract_strided_slice %111 {offsets = [32, 0], sizes = [8, 128], strides = [1, 1]} : vector<64x128xf32> to vector<8x128xf32>
    %138 = arith.truncf %137 : vector<8x128xf32> to vector<8x128xbf16>
    %c4 = arith.constant 4 : index
    %c0_59 = arith.constant 0 : index
    %c0_60 = arith.constant 0 : index
    %139 = vector.load %arg10[%c4, %c0_59, %c0_60] : memref<8x128x128xbf16, #tpu.memory_space<vmem>>, vector<1x128x128xbf16>
    %140 = vector.shape_cast %139 : vector<1x128x128xbf16> to vector<128x128xbf16>
    %cst_61 = arith.constant dense<0.000000e+00> : vector<8x128xf32>
    %141 = tpu.matmul %138, %140, %cst_61 {dimension_numbers = #tpu.dot_dimension_numbers<[1], [0], [0], [1], [0, 0, 1, 1], [], []>} : vector<8x128xbf16>, vector<128x128xbf16>, vector<8x128xf32> -> vector<8x128xf32>
    %142 = arith.addf %136, %141 : vector<8x128xf32>
    %143 = vector.extract_strided_slice %111 {offsets = [40, 0], sizes = [8, 128], strides = [1, 1]} : vector<64x128xf32> to vector<8x128xf32>
    %144 = arith.truncf %143 : vector<8x128xf32> to vector<8x128xbf16>
    %c5 = arith.constant 5 : index
    %c0_62 = arith.constant 0 : index
    %c0_63 = arith.constant 0 : index
    %145 = vector.load %arg10[%c5, %c0_62, %c0_63] : memref<8x128x128xbf16, #tpu.memory_space<vmem>>, vector<1x128x128xbf16>
    %146 = vector.shape_cast %145 : vector<1x128x128xbf16> to vector<128x128xbf16>
    %cst_64 = arith.constant dense<0.000000e+00> : vector<8x128xf32>
    %147 = tpu.matmul %144, %146, %cst_64 {dimension_numbers = #tpu.dot_dimension_numbers<[1], [0], [0], [1], [0, 0, 1, 1], [], []>} : vector<8x128xbf16>, vector<128x128xbf16>, vector<8x128xf32> -> vector<8x128xf32>
    %148 = arith.addf %142, %147 : vector<8x128xf32>
    %149 = vector.extract_strided_slice %111 {offsets = [48, 0], sizes = [8, 128], strides = [1, 1]} : vector<64x128xf32> to vector<8x128xf32>
    %150 = arith.truncf %149 : vector<8x128xf32> to vector<8x128xbf16>
    %c6 = arith.constant 6 : index
    %c0_65 = arith.constant 0 : index
    %c0_66 = arith.constant 0 : index
    %151 = vector.load %arg10[%c6, %c0_65, %c0_66] : memref<8x128x128xbf16, #tpu.memory_space<vmem>>, vector<1x128x128xbf16>
    %152 = vector.shape_cast %151 : vector<1x128x128xbf16> to vector<128x128xbf16>
    %cst_67 = arith.constant dense<0.000000e+00> : vector<8x128xf32>
    %153 = tpu.matmul %150, %152, %cst_67 {dimension_numbers = #tpu.dot_dimension_numbers<[1], [0], [0], [1], [0, 0, 1, 1], [], []>} : vector<8x128xbf16>, vector<128x128xbf16>, vector<8x128xf32> -> vector<8x128xf32>
    %154 = arith.addf %148, %153 : vector<8x128xf32>
    %155 = vector.extract_strided_slice %111 {offsets = [56, 0], sizes = [8, 128], strides = [1, 1]} : vector<64x128xf32> to vector<8x128xf32>
    %156 = arith.truncf %155 : vector<8x128xf32> to vector<8x128xbf16>
    %c7 = arith.constant 7 : index
    %c0_68 = arith.constant 0 : index
    %c0_69 = arith.constant 0 : index
    %157 = vector.load %arg10[%c7, %c0_68, %c0_69] : memref<8x128x128xbf16, #tpu.memory_space<vmem>>, vector<1x128x128xbf16>
    %158 = vector.shape_cast %157 : vector<1x128x128xbf16> to vector<128x128xbf16>
    %cst_70 = arith.constant dense<0.000000e+00> : vector<8x128xf32>
    %159 = tpu.matmul %156, %158, %cst_70 {dimension_numbers = #tpu.dot_dimension_numbers<[1], [0], [0], [1], [0, 0, 1, 1], [], []>} : vector<8x128xbf16>, vector<128x128xbf16>, vector<8x128xf32> -> vector<8x128xf32>
    %160 = arith.addf %154, %159 : vector<8x128xf32>
    %c0_71 = arith.constant 0 : index
    %c0_72 = arith.constant 0 : index
    %161 = vector.load %arg11[%c0_71, %c0_72] : memref<8x128xf32, #tpu.memory_space<vmem>>, vector<8x128xf32>
    tpu.vector_store %arg11[%c0_71, %c0_72], %160 {strides = array<i32>} : memref<8x128xf32, #tpu.memory_space<vmem>>, vector<8x128xf32>,
    return
  }
  func.func @transform_0(%arg0: i32) -> (i32, i32) {
    %c0_i32 = arith.constant 0 : i32
    %c0_i32_0 = arith.constant 0 : i32
    %c0_i32_1 = arith.constant 0 : i32
    return %c0_i32, %c0_i32_0 : i32, i32
  }
  func.func @transform_1(%arg0: i32) -> (i32, i32) {
    %c0_i32 = arith.constant 0 : i32
    %c0_i32_0 = arith.constant 0 : i32
    %c0_i32_1 = arith.constant 0 : i32
    return %c0_i32, %c0_i32_0 : i32, i32
  }
  func.func @transform_2(%arg0: i32) -> (i32, i32) {
    %c0_i32 = arith.constant 0 : i32
    %c0_i32_0 = arith.constant 0 : i32
    %c0_i32_1 = arith.constant 0 : i32
    return %c0_i32, %c0_i32_0 : i32, i32
  }
  func.func @transform_3(%arg0: i32) -> (i32, i32) {
    %c0_i32 = arith.constant 0 : i32
    %c0_i32_0 = arith.constant 0 : i32
    %c0_i32_1 = arith.constant 0 : i32
    return %c0_i32, %c0_i32_0 : i32, i32
  }
  func.func @transform_4(%arg0: i32) -> (i32, i32) {
    %c0_i32 = arith.constant 0 : i32
    %c0_i32_0 = arith.constant 0 : i32
    %c0_i32_1 = arith.constant 0 : i32
    return %c0_i32, %c0_i32_0 : i32, i32
  }
  func.func @transform_5(%arg0: i32) -> (i32, i32) {
    %c0_i32 = arith.constant 0 : i32
    %c0_i32_0 = arith.constant 0 : i32
    %c0_i32_1 = arith.constant 0 : i32
    return %c0_i32, %c0_i32_0 : i32, i32
  }
  func.func @transform_6(%arg0: i32) -> (i32, i32) {
    %c0_i32 = arith.constant 0 : i32
    %c0_i32_0 = arith.constant 0 : i32
    %c0_i32_1 = arith.constant 0 : i32
    return %c0_i32, %c0_i32_0 : i32, i32
  }
  func.func @transform_7(%arg0: i32) -> (i32, i32) {
    %c0_i32 = arith.constant 0 : i32
    %c0_i32_0 = arith.constant 0 : i32
    %c0_i32_1 = arith.constant 0 : i32
    return %c0_i32, %c0_i32_0 : i32, i32
  }
  func.func @transform_8(%arg0: i32) -> (i32, i32) {
    %c0_i32 = arith.constant 0 : i32
    %c0_i32_0 = arith.constant 0 : i32
    %c0_i32_1 = arith.constant 0 : i32
    return %c0_i32, %c0_i32_0 : i32, i32
  }
  func.func @transform_9(%arg0: i32) -> (i32, i32, i32) {
    %c0_i32 = arith.constant 0 : i32
    %c0_i32_0 = arith.constant 0 : i32
    %c0_i32_1 = arith.constant 0 : i32
    %c0_i32_2 = arith.constant 0 : i32
    return %c0_i32, %c0_i32_0, %c0_i32_1 : i32, i32, i32
  }
  func.func @transform_10(%arg0: i32) -> (i32, i32) {
    %c0_i32 = arith.constant 0 : i32
    %c0_i32_0 = arith.constant 0 : i32
    %c0_i32_1 = arith.constant 0 : i32
    return %c0_i32, %c0_i32_0 : i32, i32
  }
}

</mosaic_0001>

<bundles_post_ra>
// kernel: tpu_custom_call.1
= control target key start
LH: loop header
LB: loop body
LE: loop exit
PB: predicated region body
PF: predicated region fallthrough
CT: control target
= control target key end

     0   :  { %15 = vsyncpa [#allocation3], 0  ;;  %s4810_s0 = inlined_call_operand.hbm [shape: f32[64,128], index: 0, kind: input, shape index: {}]   ;;  %s4811_s1 = inlined_call_operand.hbm [shape: f32[64,128], index: 1, kind: input, shape index: {}]   ;;  %s4812_s2 = inlined_call_operand.hbm [shape: f32[64,64], index: 2, kind: input, shape index: {}]   ;;  %s4813_s3 = inlined_call_operand.hbm [shape: bf16[128,128], index: 3, kind: input, shape index: {}]   ;;  %s4814_s4 = inlined_call_operand.hbm [shape: bf16[128,128], index: 4, kind: input, shape index: {}]   ;;  %s4815_s5 = inlined_call_operand.hbm [shape: bf16[128,128], index: 5, kind: input, shape index: {}]   ;;  %s4816_s6 = inlined_call_operand.hbm [shape: bf16[128,128], index: 6, kind: input, shape index: {}]   ;;  %s4817_s7 = inlined_call_operand.vmem [shape: f32[1,128], index: 7, kind: input, shape index: {}]   ;;  %s4818_s8 = inlined_call_operand.vmem [shape: f32[1,128], index: 8, kind: input, shape index: {}]   ;;  %s4819_s9 = inlined_call_operand.hbm [shape: bf16[8,128,128], index: 9, kind: input, shape index: {}]   ;;  %s4820_s10 = inlined_call_operand.hbm [shape: f32[8,128], index: 10, kind: output, shape index: {}]  }
   0x1   :  { %16 = vsyncpa [#allocation6], 0 }
   0x2   :  { %17 = vsyncpa [#allocation9], 0 }
   0x3   :  { %18 = vsyncpa [#allocation12], 0 }
   0x4   :  { %19 = vsyncpa [#allocation15], 0 }
   0x5   :  { %20 = vsyncpa [#allocation4], 0  ;;  %s38_s15 = sshll.u32 %s4811_s1, 4  ;;  %s3794_s16 = smov [#allocation5]   ;;  %s39_s15 = int_to_ptr.hbm [resolvable:$true] %s38_s15 }
   0x6   :  { %s40_s17 = sshll.u32 %s3794_s16, 4  ;;  %s64_s20 = sshll.u32 %s4813_s3, 4  ;;  %s41_s17 = int_to_ptr.vmem [resolvable:$true] %s40_s17  ;;  %s65_s20 = int_to_ptr.hbm [resolvable:$true] %s64_s20 }
   0x7   :  { %s3795_s21 = smov 128   ;;  %s3796_s22 = smov 8  }
   0x8   :  { %46 = dma.hbm_to_vmem [thread:$0]  %s39_s15, 1024, %s41_s17, [#allocation6], %s3795_s21, %s3795_s21, %s3796_s22  }
   0x9   :  { %s3797_s23 = smov [#allocation8]   ;;  %s3798_s25 = smov 64  }
   0xa   :  { %s66_s24 = sshll.u32 %s3797_s23, 4  ;;  %s3799_s1 = smov 4   ;;  %s67_s24 = int_to_ptr.vmem [resolvable:$true] %s66_s24 }
   0xb   :  { %72 = dma.hbm_to_vmem [thread:$0]  %s65_s20, 1024, %s67_s24, [#allocation9], %s3798_s25, %s3798_s25, %s3799_s1  }
   0xc   :  { %s90_s3 = sshll.u32 %s4815_s5, 4  ;;  %s3800_s28 = smov [#allocation11]   ;;  %s91_s3 = int_to_ptr.hbm [resolvable:$true] %s90_s3 }
   0xd   :  { %s92_s29 = sshll.u32 %s3800_s28, 4  ;;  %s25_s12 = sshll.u32 %s4810_s0, 4  ;;  %s93_s29 = int_to_ptr.vmem [resolvable:$true] %s92_s29  ;;  %s26_s12 = int_to_ptr.hbm [resolvable:$true] %s25_s12 }
   0xe   :  { %98 = dma.hbm_to_vmem [thread:$0]  %s91_s3, 1024, %s93_s29, [#allocation12], %s3798_s25, %s3798_s25, %s3799_s1  }
   0xf   :  { %s3801_s13 = smov [#allocation2]   ;;  %s51_s17 = sshll.u32 %s4812_s2, 4  ;;  %s52_s17 = int_to_ptr.hbm [resolvable:$true] %s51_s17 }
  0x10   :  { %s27_s14 = sshll.u32 %s3801_s13, 4  ;;  %s77_s0 = sshll.u32 %s4814_s4, 4  ;;  %s28_s14 = int_to_ptr.vmem [resolvable:$true] %s27_s14  ;;  %s78_s0 = int_to_ptr.hbm [resolvable:$true] %s77_s0 }
  0x11   :  { %33 = dma.hbm_to_vmem [thread:$0]  %s26_s12, 1024, %s28_s14, [#allocation3], %s3795_s21, %s3795_s21, %s3796_s22  }
  0x12   :  { %s3802_s19 = smov [#allocation7]   ;;  %s3803_s23 = smov [#allocation10]  }
  0x13   :  { %s53_s20 = sshll.u32 %s3802_s19, 4  ;;  %s79_s2 = sshll.u32 %s3803_s23, 4  ;;  %s54_s20 = int_to_ptr.vmem [resolvable:$true] %s53_s20  ;;  %s80_s2 = int_to_ptr.vmem [resolvable:$true] %s79_s2 }
  0x14   :  { %59 = dma.hbm_to_vmem [thread:$0]  %s52_s17, 1024, %s54_s20, [#allocation6], %s3795_s21, %s3795_s21, %s3796_s22  }
  0x15   :  { %s103_s27 = sshll.u32 %s4816_s6, 4  ;;  %s120_s28 = sshll.u32 %s4819_s9, 4  ;;  %s104_s27 = int_to_ptr.hbm [resolvable:$true] %s103_s27  ;;  %s121_s28 = int_to_ptr.hbm [resolvable:$true] %s120_s28 }
  0x16   :  { %85 = dma.hbm_to_vmem [thread:$0]  %s78_s0, 1024, %s80_s2, [#allocation9], %s3798_s25, %s3798_s25, %s3799_s1  }
  0x17   :  { %s3804_s29 = smov [#allocation13]   ;;  %s3805_s21 = smov [#allocation14]  }
  0x18   :  { %s105_s30 = sshll.u32 %s3804_s29, 4  ;;  %s122_s6 = sshll.u32 %s3805_s21, 4  ;;  %s106_s30 = int_to_ptr.vmem [resolvable:$true] %s105_s30  ;;  %s123_s6 = int_to_ptr.vmem [resolvable:$true] %s122_s6 }
  0x19   :  { %111 = dma.hbm_to_vmem [thread:$0]  %s104_s27, 1024, %s106_s30, [#allocation12], %s3798_s25, %s3798_s25, %s3799_s1  }
  0x1a   :  { %128 = dma.hbm_to_vmem [thread:$0]  %s121_s28, 8192, %s123_s6, [#allocation15], %s3798_s25, %s3798_s25, %s3799_s1  }
  0x1b   :  { %3782 = dma.done.wait [#allocation3], 1024  }
  0x1c   :  { %3783 = vsyncadd [#allocation3], 4294966272 }
  0x1d   :  { %3784 = dma.done.wait [#allocation6], 2048  }
  0x1e   :  { %3785 = vsyncadd [#allocation6], 4294965248 }
  0x1f   :  { %3786 = dma.done.wait [#allocation9], 2048  }
  0x20   :  { %3787 = vsyncadd [#allocation9], 4294965248 }
  0x21   :  { %3788 = dma.done.wait [#allocation12], 2048  }
  0x22   :  { %3789 = vsyncadd [#allocation12], 4294965248 }
  0x23   :  { %3790 = dma.done.wait [#allocation15], 8192  }
  0x24   :  { %3791 = vsyncadd [#allocation15], 4294959104  ;;  %v3193_v0 = vld [vmem:[#allocation8 + $0x38] sm:$0xff]  ;;  %v3192_v2 = vld [vmem:[#allocation8 + $0x30] sm:$0xff]  ;;  %s3806_s9 = smov 96   ;;  %s3807_s22 = smov 32  }
  0x25   :  { %v3201_v1 = vld [vmem:[#allocation10 + $0x38] sm:$0xff]  ;;  %253 = vmatpush.bf16.msra.mxu0 %v3193_v0  ;;  %v3200_v3 = vld [vmem:[#allocation10 + $0x30] sm:$0xff]  ;;  %v3191_v4 = vld [vmem:[#allocation8 + $0x28] sm:$0xff]  ;;  %vm476_vm0 = vcmask 261120   ;;  %vm582_vm1 = vcmask 523264   ;;  %vm1750_vm2 = vcmask 785408  }
  0x26   :  { %346 = vmatpush.bf16.msra.mxu1 %v3201_v1  ;;  %v3199_v5 = vld [vmem:[#allocation10 + $0x28] sm:$0xff]  ;;  %v3190_v6 = vld [vmem:[#allocation8 + $0x20] sm:$0xff]  ;;  %v3189_v8 = vld [vmem:[#allocation8 + $0x18] sm:$0xff]  ;;  %s2692_s15 = sshll.u32 %s4820_s10, 4  ;;  %s2693_s15 = int_to_ptr.hbm [resolvable:$true] %s2692_s15 }
  0x27   :  { %v3198_v7 = vld [vmem:[#allocation10 + $0x20] sm:$0xff]  ;;  %v3197_v9 = vld [vmem:[#allocation10 + $0x18] sm:$0xff]  ;;  %v3188_v10 = vld [vmem:[#allocation8 + $0x10] sm:$0xff] }
  0x28   :  { %v3196_v11 = vld [vmem:[#allocation10 + $0x10] sm:$0xff]  ;;  %v3187_v12 = vld [vmem:[#allocation8 + $0x8] sm:$0xff]  ;;  %v161_v14 = vld [vmem:[#allocation2] sm:$0xff] }
  0x29   :  { %254 = vmatpush.bf16.msra.mxu0 %v3192_v2  ;;  %v3195_v13 = vld [vmem:[#allocation10 + $0x8] sm:$0xff]  ;;  %v169_v16 = vld [vmem:[#allocation5] sm:$0xff]  ;;  %v163_v23 = vld [vmem:[#allocation2 + $0x10] sm:$0xff] }
  0x2a   :  { %347 = vmatpush.bf16.msra.mxu1 %v3200_v3  ;;  %v162_v15 = vld [vmem:[#allocation2 + $0x8] sm:$0xff]  ;;  %v3913_v18 = vadd.f32 %v169_v16, %v161_v14  ;;  %v3186_v20 = vld [vmem:[#allocation8] sm:$0xff]  ;;  %v164_v24 = vld [vmem:[#allocation2 + $0x18] sm:$0xff] }
  0x2b   :  { %v170_v17 = vld [vmem:[#allocation5 + $0x8] sm:$0xff]  ;;  %v3194_v21 = vld [vmem:[#allocation10] sm:$0xff]  ;;  %v171_v25 = vld [vmem:[#allocation5 + $0x10] sm:$0xff] }
  0x2c   :  { %v3915_v19 = vadd.f32 %v170_v17, %v162_v15  ;;  %v172_v26 = vld [vmem:[#allocation5 + $0x18] sm:$0xff]  ;;  %v3919_v27 = vadd.f32 %v171_v25, %v163_v23  ;;  %v3208_v31 = vld [vmem:[#allocation11 + $0x30] sm:$0xff]  ;;  %v165_v32 = vld [vmem:[#allocation2 + $0x20] sm:$0xff] }
  0x2d   :  { %255 = vmatpush.bf16.msra.mxu0 %v3191_v4  ;;  %v3921_v28 = vadd.f32 %v172_v26, %v164_v24  ;;  %v3209_v30 = vld [vmem:[#allocation11 + $0x38] sm:$0xff]  ;;  %v166_v33 = vld [vmem:[#allocation2 + $0x28] sm:$0xff]  ;;  %v173_v34 = vld [vmem:[#allocation5 + $0x20] sm:$0xff] }
  0x2e   :  { %348 = vmatpush.bf16.msra.mxu1 %v3199_v5  ;;  %v185_v22 = vpack.c.bf16 %v3915_v19, %v3913_v18  ;;  %439 = vmatpush.bf16.msra.mxu2 %v3209_v30  ;;  %v174_v35 = vld [vmem:[#allocation5 + $0x28] sm:$0xff]  ;;  %v3925_v37 = vadd.f32 %v173_v34, %v165_v32  ;;  %v3206_v39 = vld [vmem:[#allocation11 + $0x20] sm:$0xff]  ;;  %v3205_v41 = vld [vmem:[#allocation11 + $0x18] sm:$0xff] }
  0x2f   :  { %v186_v29 = vpack.c.bf16 %v3921_v28, %v3919_v27  ;;  %v3207_v36 = vld [vmem:[#allocation11 + $0x28] sm:$0xff]  ;;  %v3927_v38 = vadd.f32 %v174_v35, %v166_v33  ;;  %v3204_v42 = vld [vmem:[#allocation11 + $0x10] sm:$0xff]  ;;  %v168_v44 = vld [vmem:[#allocation2 + $0x38] sm:$0xff] }
  0x30   :  { %v167_v43 = vld [vmem:[#allocation2 + $0x30] sm:$0xff]  ;;  %v176_v46 = vld [vmem:[#allocation5 + $0x38] sm:$0xff]  ;;  %v3203_v47 = vld [vmem:[#allocation11 + $0x8] sm:$0xff] }
  0x31   :  { %256 = vmatpush.bf16.msra.mxu0 %v3190_v6  ;;  %v187_v40 = vpack.c.bf16 %v3927_v38, %v3925_v37  ;;  %v175_v45 = vld [vmem:[#allocation5 + $0x30] sm:$0xff]  ;;  %v3933_v49 = vadd.f32 %v176_v46, %v168_v44  ;;  %v3202_v50 = vld [vmem:[#allocation11] sm:$0xff] }
  0x32   :  { %349 = vmatpush.bf16.msra.mxu1 %v3198_v7  ;;  %440 = vmatpush.bf16.msra.mxu2 %v3208_v31  ;;  %v3931_v48 = vadd.f32 %v175_v45, %v167_v43 }
  0x34   :  { %v188_v51 = vpack.c.bf16 %v3933_v49, %v3931_v48 }
  0x35   :  { %257 = vmatpush.bf16.msra.mxu0 %v3189_v8 }
  0x36   :  { %350 = vmatpush.bf16.msra.mxu1 %v3197_v9  ;;  %441 = vmatpush.bf16.msra.mxu2 %v3207_v36 }
  0x39   :  { %258 = vmatpush.bf16.msra.mxu0 %v3188_v10 }
  0x3a   :  { %351 = vmatpush.bf16.msra.mxu1 %v3196_v11  ;;  %442 = vmatpush.bf16.msra.mxu2 %v3206_v39 }
  0x3d   :  { %259 = vmatpush.bf16.msra.mxu0 %v3187_v12 }
  0x3e   :  { %352 = vmatpush.bf16.msra.mxu1 %v3195_v13  ;;  %443 = vmatpush.bf16.msra.mxu2 %v3205_v41 }
  0x41   :  { %260 = vmatpush.bf16.msra.mxu0 %v3186_v20 }
  0x42   :  { %353 = vmatpush.bf16.msra.mxu1 %v3194_v21  ;;  %444 = vmatpush.bf16.msra.mxu2 %v3204_v42 }
  0x44   :  { %261 = vmatmul.bf16.vlgmr.msra.gmra.mxu0 %v185_v22 }
  0x45   :  { %354 = vmatmul.bf16.vlgmr.msra.gmra.mxu1 %v185_v22 }
  0x46   :  { %445 = vmatpush.bf16.msra.mxu2 %v3203_v47 }
  0x4a   :  { %446 = vmatpush.bf16.msra.mxu2 %v3202_v50 }
  0x4d   :  { %447 = vmatmul.bf16.vlgmr.msra.gmra.mxu2 %v185_v22 }
  0x54   :  { %266 = vmatmul.bf16.gmra.mxu0 %v186_v29 }
  0x55   :  { %359 = vmatmul.bf16.gmra.mxu1 %v186_v29 }
  0x5d   :  { %452 = vmatmul.bf16.gmra.mxu2 %v186_v29 }
  0x64   :  { %271 = vmatmul.bf16.gmra.mxu0 %v187_v40 }
  0x65   :  { %364 = vmatmul.bf16.gmra.mxu1 %v187_v40 }
  0x6d   :  { %457 = vmatmul.bf16.gmra.mxu2 %v187_v40 }
  0x74   :  { %276 = vmatmul.bf16.gmra.mxu0 %v188_v51 }
  0x75   :  { %369 = vmatmul.bf16.gmra.mxu1 %v188_v51 }
  0x7d   :  { %462 = vmatmul.bf16.gmra.mxu2 %v188_v51 }
  0xc1   :  { %v3937_v52 = vpop.f32.mrf.mxu0 }
  0xc2   :  { %v355_v53 = vpop.f32.mrf.mxu1  ;;  %736 = vrot.lane.b32.xlu2 %v3937_v52, %s3806_s9 }
  0xc3   :  { %752 = vrot.lane.b32.xlu1 %v355_v53, %s3806_s9 }
  0xc9   :  { %v264_v54 = vpop.f32.mrf.mxu0 }
  0xca   :  { %v357_v55 = vpop.f32.mrf.mxu1 }
  0xcb   :  { %754 = vrot.lane.b32.xlu0 %v357_v55, %s3806_s9 }
  0xd0   :  { %v3966_v3 = vpop.f32.mrf.mxu2 }
  0xd1   :  { %v267_v56 = vpop.f32.mrf.mxu0 }
  0xd2   :  { %v360_v57 = vpop.f32.mrf.mxu1  ;;  %740 = vrot.lane.b32.xlu1 %v267_v56, %s3806_s9 }
  0xd3   :  { %756 = vrot.lane.b32.xlu2 %v360_v57, %s3806_s9  ;;  %738 = vrot.lane.b32.xlu0 %v264_v54, %s3806_s9 }
  0xd8   :  { %v3978_v4 = vpop.f32.mrf.mxu2 }
  0xd9   :  { %v269_v58 = vpop.f32.mrf.mxu0  ;;  %v4028_v21 = vpack.i.bf16 %v3966_v3, %v3978_v4 }
  0xda   :  { %v362_v59 = vpop.f32.mrf.mxu1 }
  0xdb   :  { %758 = vrot.lane.b32.xlu2 %v362_v59, %s3806_s9 }
  0xe0   :  { %v453_v5 = vpop.f32.mrf.mxu2 }
  0xe1   :  { %v272_v60 = vpop.f32.mrf.mxu0 }
  0xe2   :  { %v365_v61 = vpop.f32.mrf.mxu1  ;;  %744 = vrot.lane.b32.xlu0 %v272_v60, %s3806_s9 }
  0xe3   :  { %760 = vrot.lane.b32.xlu1 %v365_v61, %s3806_s9  ;;  %742 = vrot.lane.b32.xlu2 %v269_v58, %s3806_s9 }
  0xe8   :  { %v455_v7 = vpop.f32.mrf.mxu2 }
  0xe9   :  { %v274_v63 = vpop.f32.mrf.mxu0  ;;  %v4011_v13 = vpack.i.bf16 %v453_v5, %v455_v7 }
  0xea   :  { %v367_v62 = vpop.f32.mrf.mxu1 }
  0xeb   :  { %762 = vrot.lane.b32.xlu1 %v367_v62, %s3806_s9  ;;  %1066 = vrot.lane.b32.xlu2 %v365_v61, %s3798_s25 }
  0xec   :  { %1068 = vrot.lane.b32.xlu0 %v367_v62, %s3798_s25 }
  0xf0   :  { %v458_v9 = vpop.f32.mrf.mxu2 }
  0xf1   :  { %v277_v2 = vpop.f32.mrf.mxu0 }
  0xf2   :  { %v370_v0 = vpop.f32.mrf.mxu1 }
  0xf3   :  { %1366 = vrot.lane.b32.xlu1 %v367_v62, %s3807_s22  ;;  %746 = vrot.lane.b32.xlu2 %v274_v63, %s3806_s9 }
  0xf4   :  { %764 = vrot.lane.b32.xlu0 %v370_v0, %s3806_s9 }
  0xf8   :  { %v460_v11 = vpop.f32.mrf.mxu2 }
  0xf9   :  { %v4024_v20 = vpack.i.bf16 %v458_v9, %v460_v11  ;;  %v279_v26 = vpop.f32.mrf.mxu0 }
  0xfa   :  { %v372_v1 = vpop.f32.mrf.mxu1 }
  0xfb   :  { %2802 = vmatpush.xpose.msk.msra.mxu3 %vm476_vm0, %v372_v1  ;;  %1368 = vrot.lane.b32.xlu1 %v370_v0, %s3807_s22 }
  0xfc   :  { %1070 = vrot.lane.b32.xlu0 %v370_v0, %s3798_s25  ;;  %1064 = vrot.lane.b32.xlu2 %v362_v59, %s3798_s25 }
  0xff   :  { %2803 = vmatpush.xpose.msk.msra.mxu3 %vm476_vm0, %v370_v0 }
 0x100   :  { %v463_v16 = vpop.f32.mrf.mxu2 }
 0x103   :  { %2804 = vmatpush.xpose.msk.msra.mxu3 %vm476_vm0, %v367_v62  ;;  %748 = vrot.lane.b32.xlu1 %v277_v2, %s3806_s9 }
 0x104   :  { %766 = vrot.lane.b32.xlu0 %v372_v1, %s3806_s9  ;;  %1360 = vrot.lane.b32.xlu2 %v360_v57, %s3807_s22 }
 0x107   :  { %2805 = vmatpush.xpose.msk.msra.mxu3 %vm476_vm0, %v365_v61 }
 0x108   :  { %v465_v23 = vpop.f32.mrf.mxu2 }
 0x109   :  { %703 = vmatpush.msrb.mxu0 %v465_v23  ;;  %v3328_v32 = vpack.i.bf16 %v463_v16, %v465_v23  ;;  %v4132_v23 = vld [vmem:[#allocation7 + $0x10] sm:$0xff] }
 0x10b   :  { %2806 = vmatpush.xpose.msk.msra.mxu3 %vm476_vm0, %v362_v59  ;;  %1062 = vrot.lane.b32.xlu1 %v360_v57, %s3798_s25 }
 0x10c   :  { %1364 = vrot.lane.b32.xlu0 %v365_v61, %s3807_s22  ;;  %1358 = vrot.lane.b32.xlu2 %v357_v55, %s3807_s22 }
 0x10d   :  { %704 = vmatpush.msrb.mxu0 %v463_v16 }
 0x10f   :  { %2807 = vmatpush.xpose.msk.msra.mxu3 %vm476_vm0, %v360_v57  ;;  %705 = vmatpush.msrb.mxu0 %v460_v11 }
 0x111   :  { %706 = vmatpush.msrb.mxu0 %v458_v9 }
 0x113   :  { %2808 = vmatpush.xpose.msk.msra.mxu3 %vm476_vm0, %v357_v55  ;;  %1060 = vrot.lane.b32.xlu1 %v357_v55, %s3798_s25 }
 0x114   :  { %1362 = vrot.lane.b32.xlu0 %v362_v59, %s3807_s22  ;;  %1042 = vrot.lane.b32.xlu2 %v3937_v52, %s3798_s25 }
 0x115   :  { %707 = vmatpush.msrb.mxu0 %v455_v7  ;;  %v4117_v7 = vld [vmem:[#allocation7 + $0x8] sm:$0xff] }
 0x117   :  { %2809 = vmatpush.xpose.msk.msra.mxu3 %vm476_vm0, %v355_v53  ;;  %708 = vmatpush.msrb.mxu0 %v453_v5 }
 0x119   :  { %709 = vmatpush.msrb.mxu0 %v3978_v4 }
 0x11a   :  { %2810 = vmatmul.msk.f32.vlgmr.msra.gmra.mxu3 %vm476_vm0, %v3937_v52 }
 0x11b   :  { %1356 = vrot.lane.b32.xlu1 %v355_v53, %s3807_s22  ;;  %710 = vmatpush.msrb.mxu0 %v3966_v3 }
 0x11c   :  { %1058 = vrot.lane.b32.xlu0 %v355_v53, %s3798_s25  ;;  %1342 = vrot.lane.b32.xlu2 %v264_v54, %s3807_s22  ;;  %v3988_v6 = vpop.permute.xlu2 %736 }
 0x122   :  { %2811 = vmatmul.msk.f32.gmra.mxu3 %vm476_vm0, %v264_v54 }
 0x123   :  { %1044 = vrot.lane.b32.xlu1 %v264_v54, %s3798_s25 }
 0x124   :  { %1340 = vrot.lane.b32.xlu0 %v3937_v52, %s3807_s22  ;;  %1048 = vrot.lane.b32.xlu2 %v269_v58, %s3798_s25 }
 0x12a   :  { %2812 = vmatmul.msk.f32.gmra.mxu3 %vm476_vm0, %v267_v56 }
 0x12b   :  { %1344 = vrot.lane.b32.xlu1 %v267_v56, %s3807_s22 }
 0x12c   :  { %1046 = vrot.lane.b32.xlu0 %v267_v56, %s3798_s25  ;;  %1370 = vrot.lane.b32.xlu2 %v372_v1, %s3807_s22 }
 0x12d   :  { %v3997_v8 = vpop.permute.xlu2 %756 }
 0x132   :  { %2813 = vmatmul.msk.f32.gmra.mxu3 %vm476_vm0, %v269_v58 }
 0x133   :  { %1050 = vrot.lane.b32.xlu1 %v272_v60, %s3798_s25 }
 0x134   :  { %1346 = vrot.lane.b32.xlu0 %v269_v58, %s3807_s22  ;;  %1348 = vrot.lane.b32.xlu2 %v272_v60, %s3807_s22 }
 0x135   :  { %v4003_v10 = vpop.permute.xlu2 %758  ;;  %v4014_v14 = vpop.permute.xlu1 %752 }
 0x13a   :  { %2814 = vmatmul.msk.f32.gmra.mxu3 %vm476_vm0, %v272_v60 }
 0x13b   :  { %1072 = vrot.lane.b32.xlu1 %v372_v1, %s3798_s25 }
 0x13c   :  { %1052 = vrot.lane.b32.xlu0 %v274_v63, %s3798_s25  ;;  %1054 = vrot.lane.b32.xlu2 %v277_v2, %s3798_s25 }
 0x13d   :  { %v4009_v12 = vpop.permute.xlu2 %742  ;;  %v4017_v15 = vpop.permute.xlu0 %754 }
 0x142   :  { %2815 = vmatmul.msk.f32.gmra.mxu3 %vm476_vm0, %v274_v63 }
 0x143   :  { %1350 = vrot.lane.b32.xlu1 %v274_v63, %s3807_s22  ;;  %v4101_v63 = vld [vmem:[#allocation7] sm:$0xff] }
 0x144   :  { %1352 = vrot.lane.b32.xlu0 %v277_v2, %s3807_s22  ;;  %3304 = vrot.lane.b32.xlu2 %v4011_v13, %s3806_s9  ;;  %v4033_v22 = vpop.permute.xlu1 %740 }
 0x145   :  { %v4022_v17 = vpop.permute.xlu2 %1066  ;;  %v739_v25 = vpop.permute.xlu0 %738 }
 0x14a   :  { %2816 = vmatmul.msk.f32.gmra.mxu3 %vm476_vm0, %v277_v2 }
 0x14b   :  { %3299 = vrot.lane.b32.xlu1 %v4024_v20, %s3806_s9 }
 0x14c   :  { %3314 = vrot.lane.b32.xlu0 %v4024_v20, %s3807_s22  ;;  %3309 = vrot.lane.b32.xlu2 %v4028_v21, %s3806_s9 }
 0x14d   :  { %v4039_v24 = vpop.permute.xlu2 %746 }
 0x152   :  { %2817 = vmatmul.msk.f32.gmra.mxu3 %vm476_vm0, %v279_v26 }
 0x153   :  { %1056 = vrot.lane.b32.xlu1 %v279_v26, %s3798_s25 }
 0x154   :  { %3319 = vrot.lane.b32.xlu2 %v4011_v13, %s3807_s22  ;;  %750 = vrot.lane.b32.xlu0 %v279_v26, %s3806_s9  ;;  %v4046_v30 = vpop.permute.xlu0 %744 }
 0x155   :  { %v761_v29 = vpop.permute.xlu1 %760 }
 0x156   :  { %v4048_v31 = vpop.permute.xlu2 %1064 }
 0x15b   :  { %3329 = vrot.lane.b32.xlu1 %v3328_v32, %s3807_s22 }
 0x15c   :  { %1354 = vrot.lane.b32.xlu2 %v279_v26, %s3807_s22 }
 0x15d   :  { %v763_v33 = vpop.permute.xlu1 %762 }
 0x15e   :  { %v4054_v34 = vpop.permute.xlu0 %1068  ;;  %v1361_v35 = vpop.permute.xlu2 %1360 }
 0x164   :  { %3324 = vrot.lane.b32.xlu2 %v3328_v32, %s3806_s9 }
 0x165   :  { %v1367_v36 = vpop.permute.xlu1 %1366 }
 0x166   :  { %v765_v39 = vpop.permute.xlu0 %764  ;;  %v1359_v40 = vpop.permute.xlu2 %1358 }
 0x16c   :  { %3334 = vrot.lane.b32.xlu2 %v3328_v32, %s3798_s25 }
 0x16d   :  { %v1369_v41 = vpop.permute.xlu1 %1368 }
 0x16e   :  { %v4058_v42 = vpop.permute.xlu0 %1070  ;;  %v4060_v43 = vpop.permute.xlu2 %1042 }
 0x175   :  { %v4062_v44 = vpop.permute.xlu1 %748 }
 0x176   :  { %v767_v45 = vpop.permute.xlu0 %766  ;;  %v4064_v46 = vpop.permute.xlu2 %1342 }
 0x177   :  { %2826 = vmatpush.xpose.msk.msrb.mxu1 %vm476_vm0, %v767_v45 }
 0x17b   :  { %2827 = vmatpush.xpose.msk.msrb.mxu1 %vm476_vm0, %v765_v39 }
 0x17d   :  { %v4068_v47 = vpop.permute.xlu1 %1062 }
 0x17e   :  { %v1365_v50 = vpop.permute.xlu0 %1364  ;;  %v4070_v51 = vpop.permute.xlu2 %1048 }
 0x17f   :  { %2828 = vmatpush.xpose.msk.msrb.mxu1 %vm476_vm0, %v763_v33 }
 0x183   :  { %2829 = vmatpush.xpose.msk.msrb.mxu1 %vm476_vm0, %v761_v29 }
 0x185   :  { %v4074_v52 = vpop.permute.xlu1 %1060 }
 0x186   :  { %v1363_v53 = vpop.permute.xlu0 %1362  ;;  %v1371_v54 = vpop.permute.xlu2 %1370 }
 0x187   :  { %2830 = vmatpush.xpose.msk.msrb.mxu1 %vm476_vm0, %v4003_v10 }
 0x18b   :  { %2831 = vmatpush.xpose.msk.msrb.mxu1 %vm476_vm0, %v3997_v8 }
 0x18d   :  { %v1357_v55 = vpop.permute.xlu1 %1356 }
 0x18e   :  { %v4080_v56 = vpop.permute.xlu0 %1058  ;;  %v4082_v57 = vpop.permute.xlu2 %1348 }
 0x18f   :  { %2832 = vmatpush.xpose.msk.msrb.mxu1 %vm476_vm0, %v4017_v15 }
 0x193   :  { %2833 = vmatpush.xpose.msk.msrb.mxu1 %vm476_vm0, %v4014_v14 }
 0x195   :  { %v4089_v58 = vpop.permute.xlu1 %1044 }
 0x196   :  { %2834 = vmatmul.msk.f32.vlgmr.msrb.gmra.mxu1 %vm476_vm0, %v3988_v6  ;;  %v4093_v59 = vpop.permute.xlu0 %1340  ;;  %v4095_v60 = vpop.permute.xlu2 %1054 }
 0x197   :  { %2874 = vmatpush.xpose.msk.msra.mxu1 %vm476_vm0, %v1371_v54 }
 0x19b   :  { %2875 = vmatpush.xpose.msk.msra.mxu1 %vm476_vm0, %v1369_v41 }
 0x19d   :  { %v542_v61 = vpop.f32.mrf.mxu3  ;;  %v4099_v62 = vpop.permute.xlu1 %1344 }
 0x19e   :  { %v566_v0 = vmul.f32 0.17677669, %v542_v61  ;;  %2835 = vmatmul.msk.f32.gmra.mxu1 %vm476_vm0, %v739_v25  ;;  %v4104_v1 = vpop.permute.xlu0 %1046  ;;  %v4106_v2 = vpop.permute.xlu2 %3304 }
 0x19f   :  { %2876 = vmatpush.xpose.msk.msra.mxu1 %vm476_vm0, %v1367_v36 }
 0x1a0   :  { %v4110_v3 = vadd.f32 %v566_v0, %v4101_v63 }
 0x1a2   :  { %v583_v4 = vsel %vm582_vm1, %v4110_v3, -inf }
 0x1a3   :  { %2877 = vmatpush.xpose.msk.msra.mxu1 %vm476_vm0, %v1365_v50  ;;  %584 = vmax.xlane.f32.xlu1 %v583_v4 }
 0x1a5   :  { %v545_v5 = vpop.f32.mrf.mxu3  ;;  %v4115_v6 = vpop.permute.xlu1 %1050 }
 0x1a6   :  { %v567_v8 = vmul.f32 0.17677669, %v545_v5  ;;  %2836 = vmatmul.msk.f32.gmra.mxu1 %vm476_vm0, %v4033_v22  ;;  %v4121_v9 = vpop.permute.xlu0 %1346  ;;  %v4123_v10 = vpop.permute.xlu2 %3309 }
 0x1a7   :  { %2878 = vmatpush.xpose.msk.msra.mxu1 %vm476_vm0, %v1363_v53 }
 0x1a8   :  { %v4127_v11 = vadd.f32 %v567_v8, %v4117_v7  ;;  %v4183_v8 = vld [vmem:[#allocation7 + $0x28] sm:$0xff] }
 0x1aa   :  { %v586_v14 = vsel %vm582_vm1, %v4127_v11, -inf }
 0x1ab   :  { %2879 = vmatpush.xpose.msk.msra.mxu1 %vm476_vm0, %v1361_v35  ;;  %587 = vmax.xlane.f32.xlu2 %v586_v14  ;;  %v4151_v35 = vld [vmem:[#allocation7 + $0x18] sm:$0xff]  ;;  %v3306_v14 = vunpack.i.l.bf16 %v4106_v2 }
 0x1ad   :  { %v548_v15 = vpop.f32.mrf.mxu3  ;;  %v1073_v16 = vpop.permute.xlu1 %1072 }
 0x1ae   :  { %v568_v22 = vmul.f32 0.17677669, %v548_v15  ;;  %2837 = vmatmul.msk.f32.gmra.mxu1 %vm476_vm0, %v4009_v12  ;;  %v4136_v25 = vpop.permute.xlu0 %1052  ;;  %v4138_v26 = vpop.permute.xlu2 %3319  ;;  %2850 = vmatpush.xpose.msk.msrb.mxu3 %vm476_vm0, %v1073_v16 }
 0x1af   :  { %2880 = vmatpush.xpose.msk.msra.mxu1 %vm476_vm0, %v1359_v40 }
 0x1b0   :  { %v4143_v29 = vadd.f32 %v568_v22, %v4132_v23  ;;  %v3311_v22 = vunpack.i.l.bf16 %v4123_v10 }
 0x1b2   :  { %2851 = vmatpush.xpose.msk.msrb.mxu3 %vm476_vm0, %v4058_v42  ;;  %v589_v32 = vsel %vm582_vm1, %v4143_v29, -inf }
 0x1b3   :  { %2881 = vmatpush.xpose.msk.msra.mxu1 %vm476_vm0, %v1357_v55  ;;  %590 = vmax.xlane.f32.xlu1 %v589_v32 }
 0x1b5   :  { %v551_v33 = vpop.f32.mrf.mxu3  ;;  %v4149_v12 = vpop.permute.xlu1 %1350 }
 0x1b6   :  { %v569_v36 = vmul.f32 0.17677669, %v551_v33  ;;  %2838 = vmatmul.msk.f32.gmra.mxu1 %vm476_vm0, %v4046_v30  ;;  %v4155_v39 = vpop.permute.xlu2 %1354  ;;  %2852 = vmatpush.xpose.msk.msrb.mxu3 %vm476_vm0, %v4054_v34  ;;  %v4159_v40 = vpop.permute.xlu0 %1352  ;;  %v4168_v30 = vld [vmem:[#allocation7 + $0x20] sm:$0xff] }
 0x1b8   :  { %v4162_v41 = vadd.f32 %v569_v36, %v4151_v35 }
 0x1ba   :  { %2853 = vmatpush.xpose.msk.msrb.mxu3 %vm476_vm0, %v4022_v17  ;;  %v592_v42 = vsel %vm582_vm1, %v4162_v41, -inf }
 0x1bb   :  { %593 = vmax.xlane.f32.xlu0 %v592_v42 }
 0x1bd   :  { %v554_v45 = vpop.f32.mrf.mxu3  ;;  %v3300_v50 = vpop.permute.xlu1 %3299 }
 0x1be   :  { %v570_v53 = vmul.f32 0.17677669, %v554_v45  ;;  %2839 = vmatmul.msk.f32.gmra.mxu1 %vm476_vm0, %v4039_v24  ;;  %2854 = vmatpush.xpose.msk.msrb.mxu3 %vm476_vm0, %v4048_v31  ;;  %v3325_v34 = vpop.permute.xlu2 %3324  ;;  %v3301_v61 = vunpack.i.l.bf16 %v3300_v50  ;;  %v3315_v0 = vpop.permute.xlu0 %3314  ;;  %v3302_v24 = vunpack.i.h.bf16 %v3300_v50 }
 0x1bf   :  { %v3326_v54 = vunpack.i.l.bf16 %v3325_v34  ;;  %v3327_v55 = vunpack.i.h.bf16 %v3325_v34  ;;  %v3316_v50 = vunpack.i.l.bf16 %v3315_v0 }
 0x1c0   :  { %v4175_v17 = vadd.f32 %v570_v53, %v4168_v30 }
 0x1c1   :  { %1009 = vmatpush.msrb.mxu2 %v3326_v54 }
 0x1c2   :  { %2855 = vmatpush.xpose.msk.msrb.mxu3 %vm476_vm0, %v4068_v47  ;;  %v595_v4 = vsel %vm582_vm1, %v4175_v17, -inf  ;;  %v3307_v47 = vunpack.i.h.bf16 %v4106_v2  ;;  %v4202_v2 = vld [vmem:[#allocation7 + $0x30] sm:$0xff] }
 0x1c3   :  { %596 = vmax.xlane.f32.xlu2 %v595_v4  ;;  %1010 = vmatpush.msrb.mxu2 %v3327_v55  ;;  %v4213_v55 = vld [vmem:[#allocation7 + $0x38] sm:$0xff] }
 0x1c5   :  { %v557_v5 = vpop.f32.mrf.mxu3  ;;  %v4181_v31 = vpop.permute.xlu1 %1056  ;;  %1011 = vmatpush.msrb.mxu2 %v3301_v61  ;;  %v3322_v61 = vunpack.i.h.bf16 %v4138_v26 }
 0x1c6   :  { %v571_v15 = vmul.f32 0.17677669, %v557_v5  ;;  %2840 = vmatmul.msk.f32.gmra.mxu1 %vm476_vm0, %v4062_v44  ;;  %2856 = vmatpush.xpose.msk.msrb.mxu3 %vm476_vm0, %v4074_v52  ;;  %v3312_v44 = vunpack.i.h.bf16 %v4123_v10  ;;  %v751_v52 = vpop.permute.xlu0 %750  ;;  %v3317_v10 = vunpack.i.h.bf16 %v3315_v0 }
 0x1c7   :  { %1012 = vmatpush.msrb.mxu2 %v3302_v24 }
 0x1c8   :  { %v4192_v16 = vadd.f32 %v571_v15, %v4183_v8 }
 0x1c9   :  { %1013 = vmatpush.msrb.mxu2 %v3306_v14 }
 0x1ca   :  { %2857 = vmatpush.xpose.msk.msrb.mxu3 %vm476_vm0, %v4080_v56  ;;  %v598_v32 = vsel %vm582_vm1, %v4192_v16, -inf }
 0x1cb   :  { %599 = vmax.xlane.f32.xlu1 %v598_v32  ;;  %1014 = vmatpush.msrb.mxu2 %v3307_v47 }
 0x1cd   :  { %v560_v33 = vpop.f32.mrf.mxu3  ;;  %2858 = vmatmul.msk.f32.vlgmr.msrb.gmra.mxu3 %vm476_vm0, %v4060_v43  ;;  %1015 = vmatpush.msrb.mxu2 %v3311_v22  ;;  %v3330_v36 = vpop.permute.xlu1 %3329  ;;  %v3321_v43 = vunpack.i.l.bf16 %v4138_v26 }
 0x1ce   :  { %v572_v42 = vmul.f32 0.17677669, %v560_v33  ;;  %2841 = vmatmul.msk.f32.gmra.mxu1 %vm476_vm0, %v751_v52  ;;  %v3332_v56 = vunpack.i.h.bf16 %v3330_v36  ;;  %v3331_v45 = vunpack.i.l.bf16 %v3330_v36 }
 0x1cf   :  { %1016 = vmatpush.msrb.mxu2 %v3312_v44 }
 0x1d0   :  { %v4206_v53 = vadd.f32 %v572_v42, %v4202_v2 }
 0x1d1   :  { %1605 = vmatpush.msra.mxu2 %v3331_v45 }
 0x1d2   :  { %v601_v34 = vsel %vm582_vm1, %v4206_v53, -inf }
 0x1d3   :  { %1606 = vmatpush.msra.mxu2 %v3332_v56  ;;  %602 = vmax.xlane.f32.xlu0 %v601_v34 }
 0x1d5   :  { %1607 = vmatpush.msra.mxu2 %v3316_v50  ;;  %v563_v54 = vpop.f32.mrf.mxu3  ;;  %2859 = vmatmul.msk.f32.gmra.mxu3 %vm476_vm0, %v4089_v58  ;;  %v3335_v58 = vpop.permute.xlu2 %3334 }
 0x1d6   :  { %v573_v4 = vmul.f32 0.17677669, %v563_v54  ;;  %2882 = vmatmul.msk.f32.vlgmr.msra.gmra.mxu1 %vm476_vm0, %v4093_v59  ;;  %v3336_v59 = vunpack.i.l.bf16 %v3335_v58  ;;  %v3337_v26 = vunpack.i.h.bf16 %v3335_v58 }
 0x1d7   :  { %1608 = vmatpush.msra.mxu2 %v3317_v10 }
 0x1d8   :  { %v4219_v0 = vadd.f32 %v573_v4, %v4213_v55  ;;  %1307 = vmatpush.msra.mxu0 %v3336_v59 }
 0x1d9   :  { %1609 = vmatpush.msra.mxu2 %v3321_v43 }
 0x1da   :  { %v604_v24 = vsel %vm582_vm1, %v4219_v0, -inf  ;;  %1308 = vmatpush.msra.mxu0 %v3337_v26 }
 0x1db   :  { %1610 = vmatpush.msra.mxu2 %v3322_v61  ;;  %605 = vmax.xlane.f32.xlu2 %v604_v24 }
 0x1dd   :  { %2860 = vmatmul.msk.f32.gmra.mxu3 %vm476_vm0, %v4104_v1 }
 0x1de   :  { %2883 = vmatmul.msk.f32.gmra.mxu1 %vm476_vm0, %v4064_v46 }
 0x1e5   :  { %2861 = vmatmul.msk.f32.gmra.mxu3 %vm476_vm0, %v4070_v51 }
 0x1e6   :  { %2884 = vmatmul.msk.f32.gmra.mxu1 %vm476_vm0, %v4099_v62 }
 0x1ed   :  { %2862 = vmatmul.msk.f32.gmra.mxu3 %vm476_vm0, %v4115_v6 }
 0x1ee   :  { %2885 = vmatmul.msk.f32.gmra.mxu1 %vm476_vm0, %v4121_v9 }
 0x1f5   :  { %2863 = vmatmul.msk.f32.gmra.mxu3 %vm476_vm0, %v4136_v25 }
 0x1f6   :  { %2886 = vmatmul.msk.f32.gmra.mxu1 %vm476_vm0, %v4082_v57 }
 0x1fd   :  { %2864 = vmatmul.msk.f32.gmra.mxu3 %vm476_vm0, %v4095_v60 }
 0x1fe   :  { %2887 = vmatmul.msk.f32.gmra.mxu1 %vm476_vm0, %v4149_v12 }
 0x205   :  { %2865 = vmatmul.msk.f32.gmra.mxu3 %vm476_vm0, %v4181_v31 }
 0x206   :  { %2888 = vmatmul.msk.f32.gmra.mxu1 %vm476_vm0, %v4159_v40 }
 0x20e   :  { %2889 = vmatmul.msk.f32.gmra.mxu1 %vm476_vm0, %v4155_v39 }
 0x213   :  { %v817_v46 = vpop.f32.mrf.mxu1 }
 0x214   :  { %v841_v51 = vmul.f32 0.17677669, %v817_v46 }
 0x216   :  { %v585_v62 = vpop.xlane.xlu1 %584  ;;  %v4250_v57 = vadd.f32 %v841_v51, %v4101_v63 }
 0x217   :  { %v607_v60 = vsub.f32 %v4110_v3, %v585_v62 }
 0x218   :  { %v857_v1 = vsel %vm582_vm1, %v4250_v57, -inf }
 0x219   :  { %v615_v6 = vmul.f32 1.442695, %v607_v60  ;;  %858 = vmax.xlane.f32.xlu0 %v857_v1 }
 0x21b   :  { %3420 = vpow2.f32 %v615_v6  ;;  %v820_v9 = vpop.f32.mrf.mxu1 }
 0x21c   :  { %v842_v25 = vmul.f32 0.17677669, %v820_v9 }
 0x21e   :  { %v4256_v12 = vadd.f32 %v842_v25, %v4117_v7  ;;  %v588_v36 = vpop.xlane.xlu2 %587 }
 0x21f   :  { %v608_v45 = vsub.f32 %v4127_v11, %v588_v36 }
 0x220   :  { %v860_v39 = vsel %vm582_vm1, %v4256_v12, -inf }
 0x221   :  { %v4260_v40 = vpop.eup %3420  ;;  %861 = vmax.xlane.f32.xlu2 %v860_v39  ;;  %v617_v34 = vmul.f32 1.442695, %v608_v45 }
 0x222   :  { %v631_v3 = vsel %vm582_vm1, %v4260_v40, 0.0 }
 0x223   :  { %632 = vadd.xlane.f32.xlu1 %v631_v3  ;;  %v823_v5 = vpop.f32.mrf.mxu1  ;;  %3422 = vpow2.f32 %v617_v34 }
 0x224   :  { %v843_v50 = vmul.f32 0.17677669, %v823_v5 }
 0x226   :  { %v591_v54 = vpop.xlane.xlu1 %590  ;;  %v4278_v4 = vadd.f32 %v843_v50, %v4132_v23 }
 0x227   :  { %v609_v11 = vsub.f32 %v4143_v29, %v591_v54 }
 0x228   :  { %v863_v59 = vsel %vm582_vm1, %v4278_v4, -inf }
 0x229   :  { %v619_v51 = vmul.f32 1.442695, %v609_v11  ;;  %v4290_v6 = vpop.eup %3422 }
 0x22a   :  { %v634_v5 = vsel %vm582_vm1, %v4290_v6, 0.0 }
 0x22b   :  { %v826_v31 = vpop.f32.mrf.mxu1  ;;  %3424 = vpow2.f32 %v619_v51 }
 0x22c   :  { %v844_v46 = vmul.f32 0.17677669, %v826_v31 }
 0x22e   :  { %v594_v60 = vpop.xlane.xlu0 %593  ;;  %v4293_v9 = vadd.f32 %v844_v46, %v4151_v35 }
 0x22f   :  { %v610_v25 = vsub.f32 %v4162_v41, %v594_v60 }
 0x231   :  { %v4310_v41 = vpop.eup %3424 }
 0x232   :  { %v637_v45 = vsel %vm582_vm1, %v4310_v41, 0.0 }
 0x233   :  { %v829_v14 = vpop.f32.mrf.mxu1 }
 0x234   :  { %v845_v3 = vmul.f32 0.17677669, %v829_v14 }
 0x23b   :  { %v832_v15 = vpop.f32.mrf.mxu1 }
 0x243   :  { %v4269_v52 = vpop.f32.mrf.mxu1 }
 0x24b   :  { %v4280_v24 = vpop.f32.mrf.mxu1 }
 0x250   :  { %v1123_v47 = vpop.f32.mrf.mxu3 }
 0x251   :  { %v1147_v22 = vmul.f32 0.17677669, %v1123_v47  ;;  %v866_v47 = vsel %vm582_vm1, %v4293_v9, -inf }
 0x253   :  { %v4265_v32 = vadd.f32 %v1147_v22, %v4101_v63  ;;  %v4299_v39 = vpop.f32.mrf.mxu1  ;;  %v621_v22 = vmul.f32 1.442695, %v610_v25 }
 0x255   :  { %v1163_v44 = vsel %vm582_vm1, %v4265_v32, -inf  ;;  %3426 = vpow2.f32 %v621_v22 }
 0x256   :  { %1164 = vmax.xlane.f32.xlu0 %v1163_v44  ;;  %v603_v44 = vpop.xlane.xlu0 %602 }
 0x257   :  { %v613_v36 = vsub.f32 %v4206_v53, %v603_v44 }
 0x258   :  { %v1126_v33 = vpop.f32.mrf.mxu3 }
 0x259   :  { %v1148_v42 = vmul.f32 0.17677669, %v1126_v33  ;;  %v4308_v33 = vadd.f32 %v845_v3, %v4168_v30  ;;  %v627_v34 = vmul.f32 1.442695, %v613_v36 }
 0x25b   :  { %v4272_v56 = vadd.f32 %v1148_v42, %v4117_v7  ;;  %v869_v50 = vsel %vm582_vm1, %v4308_v33, -inf  ;;  %v4320_v54 = vpop.eup %3426  ;;  %3428 = vpow2.f32 %v627_v34 }
 0x25c   :  { %v640_v53 = vsel %vm582_vm1, %v4320_v54, 0.0 }
 0x25d   :  { %v1166_v10 = vsel %vm582_vm1, %v4272_v56, -inf }
 0x25e   :  { %1167 = vmax.xlane.f32.xlu0 %v1166_v10  ;;  %v1424_v10 = vpop.f32.mrf.mxu1 }
 0x25f   :  { %v1446_v60 = vmul.f32 0.17677669, %v1424_v10 }
 0x260   :  { %v1129_v43 = vpop.f32.mrf.mxu3 }
 0x261   :  { %v1149_v61 = vmul.f32 0.17677669, %v1129_v43  ;;  %v4331_v51 = vpop.eup %3428 }
 0x263   :  { %v4283_v58 = vadd.f32 %v1149_v61, %v4132_v23  ;;  %v846_v61 = vmul.f32 0.17677669, %v832_v15  ;;  %v847_v15 = vmul.f32 0.17677669, %v4269_v52 }
 0x265   :  { %v1169_v26 = vsel %vm582_vm1, %v4283_v58, -inf  ;;  %v4329_v46 = vadd.f32 %v846_v61, %v4183_v8 }
 0x266   :  { %864 = vmax.xlane.f32.xlu0 %v863_v59  ;;  %1170 = vmax.xlane.f32.xlu2 %v1169_v26  ;;  %v4326_v59 = vpop.f32.mrf.mxu1  ;;  %v597_v26 = vpop.xlane.xlu2 %596 }
 0x267   :  { %v872_v25 = vsel %vm582_vm1, %v4329_v46, -inf }
 0x268   :  { %v1132_v62 = vpop.f32.mrf.mxu3 }
 0x269   :  { %v1150_v1 = vmul.f32 0.17677669, %v1132_v62  ;;  %v611_v62 = vsub.f32 %v4175_v17, %v597_v26  ;;  %v4345_v17 = vadd.f32 %v847_v15, %v4202_v2  ;;  %v1445_v15 = vmul.f32 0.17677669, %v4299_v39 }
 0x26b   :  { %v4296_v29 = vadd.f32 %v1150_v1, %v4151_v35  ;;  %v649_v1 = vsel %vm582_vm1, %v4331_v51, 0.0  ;;  %v623_v3 = vmul.f32 1.442695, %v611_v62  ;;  %v875_v44 = vsel %vm582_vm1, %v4345_v17, -inf }
 0x26d   :  { %v1172_v31 = vsel %vm582_vm1, %v4296_v29, -inf  ;;  %3430 = vpow2.f32 %v623_v3  ;;  %v4376_v3 = vadd.f32 %v1445_v15, %v4101_v63 }
 0x26e   :  { %635 = vadd.xlane.f32.xlu0 %v634_v5  ;;  %1173 = vmax.xlane.f32.xlu1 %v1172_v31  ;;  %v4342_v31 = vadd.f32 %v1446_v60, %v4117_v7  ;;  %v1430_v52 = vpop.f32.mrf.mxu1 }
 0x26f   :  { %867 = vmax.xlane.f32.xlu2 %v866_v47  ;;  %v1448_v47 = vmul.f32 0.17677669, %v1430_v52  ;;  %v1461_v39 = vsel %vm582_vm1, %v4376_v3, -inf }
 0x270   :  { %v1135_v14 = vpop.f32.mrf.mxu3  ;;  %v1464_v22 = vsel %vm582_vm1, %v4342_v31, -inf }
 0x271   :  { %v1151_v42 = vmul.f32 0.17677669, %v1135_v14  ;;  %v600_v14 = vpop.xlane.xlu1 %599 }
 0x273   :  { %v4318_v43 = vadd.f32 %v1151_v42, %v4168_v30  ;;  %v4354_v7 = vpop.eup %3430 }
 0x275   :  { %v1175_v11 = vsel %vm582_vm1, %v4318_v43, -inf }
 0x276   :  { %638 = vadd.xlane.f32.xlu0 %v637_v45  ;;  %870 = vmax.xlane.f32.xlu1 %v869_v50  ;;  %v643_v50 = vsel %vm582_vm1, %v4354_v7, 0.0 }
 0x278   :  { %v1138_v5 = vpop.f32.mrf.mxu3 }
 0x27e   :  { %641 = vadd.xlane.f32.xlu1 %v640_v53  ;;  %1176 = vmax.xlane.f32.xlu0 %v1175_v11  ;;  %v1433_v11 = vpop.f32.mrf.mxu1 }
 0x280   :  { %v1141_v36 = vpop.f32.mrf.mxu3 }
 0x281   :  { %v1153_v42 = vmul.f32 0.17677669, %v1141_v36 }
 0x283   :  { %v4361_v34 = vadd.f32 %v1153_v42, %v4202_v2 }
 0x285   :  { %v1181_v53 = vsel %vm582_vm1, %v4361_v34, -inf }
 0x286   :  { %650 = vadd.xlane.f32.xlu1 %v649_v1  ;;  %873 = vmax.xlane.f32.xlu0 %v872_v25  ;;  %v612_v1 = vsub.f32 %v4192_v16, %v600_v14  ;;  %v1436_v25 = vpop.f32.mrf.mxu1 }
 0x287   :  { %3339 = vrot.lane.b32.xlu2 %v4024_v20, %s3798_s25  ;;  %v4352_v20 = vadd.f32 %v1448_v47, %v4151_v35  ;;  %v848_v35 = vmul.f32 0.17677669, %v4280_v24  ;;  %v1152_v24 = vmul.f32 0.17677669, %v1138_v5 }
 0x288   :  { %v625_v52 = vmul.f32 1.442695, %v612_v1 }
 0x289   :  { %v1470_v45 = vsel %vm582_vm1, %v4352_v20, -inf  ;;  %v4369_v62 = vadd.f32 %v848_v35, %v4213_v55  ;;  %v4379_v47 = vadd.f32 %v1152_v24, %v4183_v8  ;;  %v1450_v24 = vmul.f32 0.17677669, %v1436_v25 }
 0x28b   :  { %v878_v60 = vsel %vm582_vm1, %v4369_v62, -inf  ;;  %v1178_v16 = vsel %vm582_vm1, %v4379_v47, -inf }
 0x28c   :  { %v859_v5 = vpop.xlane.xlu0 %858 }
 0x28e   :  { %1465 = vmax.xlane.f32.xlu1 %v1464_v22  ;;  %876 = vmax.xlane.f32.xlu0 %v875_v44  ;;  %v1449_v22 = vmul.f32 0.17677669, %v1433_v11  ;;  %v1439_v36 = vpop.f32.mrf.mxu1 }
 0x290   :  { %v4387_v63 = vadd.f32 %v1449_v22, %v4168_v30  ;;  %v4419_v22 = vadd.f32 %v1450_v24, %v4183_v8 }
 0x296   :  { %v633_v10 = vpop.xlane.xlu1 %632  ;;  %1471 = vmax.xlane.f32.xlu1 %v1470_v45  ;;  %644 = vadd.xlane.f32.xlu0 %v643_v50  ;;  %v881_v45 = vsub.f32 %v4250_v57, %v859_v5  ;;  %v1451_v50 = vmul.f32 0.17677669, %v1439_v36 }
 0x297   :  { %3432 = vrcp.f32 %v633_v10  ;;  %v1473_v10 = vsel %vm582_vm1, %v4387_v63, -inf }
 0x298   :  { %3434 = vpow2.f32 %v625_v52  ;;  %v4397_v30 = vadd.f32 %v1451_v50, %v4202_v2 }
 0x29a   :  { %v1479_v11 = vsel %vm582_vm1, %v4397_v30, -inf }
 0x29d   :  { %v3433_v61 = vpop.eup %3432 }
 0x29e   :  { %1182 = vmax.xlane.f32.xlu0 %v1181_v53  ;;  %v663_v26 = vmul.f32 %v3433_v61, %v4260_v40  ;;  %v606_v40 = vpop.xlane.xlu2 %605  ;;  %v4389_v42 = vpop.eup %3434  ;;  %v889_v61 = vmul.f32 1.442695, %v881_v45 }
 0x29f   :  { %v614_v44 = vsub.f32 %v4219_v0, %v606_v40  ;;  %v646_v0 = vsel %vm582_vm1, %v4389_v42, 0.0 }
 0x2a0   :  { %2818 = vmatmul.msk.f32.vlgmr.msrb.gmra.mxu0 %vm582_vm1, %v663_v26  ;;  %v1447_v26 = vmul.f32 0.17677669, %v4326_v59 }
 0x2a1   :  { %v629_v14 = vmul.f32 1.442695, %v614_v44 }
 0x2a2   :  { %v4410_v2 = vadd.f32 %v1447_v26, %v4132_v23 }
 0x2a3   :  { %3436 = vpow2.f32 %v629_v14 }
 0x2a4   :  { %3438 = vpow2.f32 %v889_v61  ;;  %v1467_v52 = vsel %vm582_vm1, %v4410_v2, -inf }
 0x2a6   :  { %879 = vmax.xlane.f32.xlu0 %v878_v60  ;;  %v862_v35 = vpop.xlane.xlu2 %861 }
 0x2a7   :  { %v882_v57 = vsub.f32 %v4256_v12, %v862_v35 }
 0x2a9   :  { %v4399_v53 = vpop.eup %3436  ;;  %v891_v60 = vmul.f32 1.442695, %v882_v57 }
 0x2aa   :  { %v652_v15 = vsel %vm582_vm1, %v4399_v53, 0.0  ;;  %v4407_v1 = vpop.eup %3438 }
 0x2ab   :  { %3440 = vpow2.f32 %v891_v60  ;;  %v905_v12 = vsel %vm582_vm1, %v4407_v1, 0.0 }
 0x2ae   :  { %1462 = vmax.xlane.f32.xlu0 %v1461_v39  ;;  %v1476_v39 = vsel %vm582_vm1, %v4419_v22, -inf }
 0x2b0   :  { %1179 = vmax.xlane.f32.xlu2 %v1178_v16 }
 0x2b1   :  { %v4416_v40 = vpop.eup %3440 }
 0x2b2   :  { %v908_v23 = vsel %vm582_vm1, %v4416_v40, 0.0 }
 0x2b6   :  { %1474 = vmax.xlane.f32.xlu0 %v1473_v10 }
 0x2b8   :  { %647 = vadd.xlane.f32.xlu2 %v646_v0 }
 0x2be   :  { %1480 = vmax.xlane.f32.xlu0 %v1479_v11 }
 0x2c0   :  { %653 = vadd.xlane.f32.xlu2 %v652_v15 }
 0x2c6   :  { %906 = vadd.xlane.f32.xlu0 %v905_v12 }
 0x2c8   :  { %1468 = vmax.xlane.f32.xlu2 %v1467_v52 }
 0x2c9   :  { %v1165_v59 = vpop.xlane.xlu0 %1164 }
 0x2ca   :  { %v1187_v0 = vsub.f32 %v4265_v32, %v1165_v59 }
 0x2cc   :  { %v1195_v57 = vmul.f32 1.442695, %v1187_v0 }
 0x2ce   :  { %909 = vadd.xlane.f32.xlu0 %v908_v23 }
 0x2d0   :  { %1477 = vmax.xlane.f32.xlu2 %v1476_v39 }
 0x2d1   :  { %v4425_v44 = vpop.xlane.xlu0 %1167 }
 0x2d9   :  { %v865_v25 = vpop.xlane.xlu0 %864  ;;  %v4427_v16 = vpop.xlane.xlu2 %1170 }
 0x2da   :  { %v883_v5 = vsub.f32 %v4278_v4, %v865_v25 }
 0x2dc   :  { %v893_v14 = vmul.f32 1.442695, %v883_v5 }
 0x2de   :  { %3442 = vpow2.f32 %v893_v14 }
 0x2e1   :  { %v636_v36 = vpop.xlane.xlu0 %635  ;;  %v4430_v8 = vpop.xlane.xlu1 %1173 }
 0x2e2   :  { %3444 = vrcp.f32 %v636_v36  ;;  %v868_v45 = vpop.xlane.xlu2 %867 }
 0x2e3   :  { %v884_v50 = vsub.f32 %v4293_v9, %v868_v45 }
 0x2e4   :  { %v4433_v10 = vpop.eup %3442 }
 0x2e5   :  { %v895_v61 = vmul.f32 1.442695, %v884_v50  ;;  %v911_v35 = vsel %vm582_vm1, %v4433_v10, 0.0 }
 0x2e6   :  { %912 = vadd.xlane.f32.xlu0 %v911_v35 }
 0x2e7   :  { %3446 = vpow2.f32 %v895_v61 }
 0x2e8   :  { %v3445_v4 = vpop.eup %3444 }
 0x2e9   :  { %v639_v11 = vpop.xlane.xlu0 %638  ;;  %v871_v26 = vpop.xlane.xlu1 %870  ;;  %v664_v15 = vmul.f32 %v3445_v4, %v4290_v6 }
 0x2ea   :  { %3448 = vrcp.f32 %v639_v11  ;;  %v885_v60 = vsub.f32 %v4308_v33, %v871_v26  ;;  %v3340_v9 = vpop.permute.xlu2 %3339 }
 0x2eb   :  { %v3341_v12 = vunpack.i.l.bf16 %v3340_v9  ;;  %2819 = vmatmul.msk.f32.gmra.mxu0 %vm582_vm1, %v664_v15  ;;  %3450 = vpow2.f32 %v1195_v57  ;;  %v3342_v52 = vunpack.i.h.bf16 %v3340_v9  ;;  %v1442_v57 = vpop.f32.mrf.mxu1  ;;  %v1188_v15 = vsub.f32 %v4272_v56, %v4425_v44 }
 0x2ec   :  { %v897_v32 = vmul.f32 1.442695, %v885_v60  ;;  %v1452_v9 = vmul.f32 0.17677669, %v1442_v57 }
 0x2ed   :  { %v4441_v24 = vpop.eup %3446  ;;  %1309 = vmatpush.msra.mxu0 %v3341_v12 }
 0x2ee   :  { %3452 = vpow2.f32 %v897_v32  ;;  %v914_v59 = vsel %vm582_vm1, %v4441_v24, 0.0 }
 0x2ef   :  { %915 = vadd.xlane.f32.xlu1 %v914_v59  ;;  %1310 = vmatpush.msra.mxu0 %v3342_v52  ;;  %v4470_v52 = vadd.f32 %v1452_v9, %v4213_v55 }
 0x2f0   :  { %v3449_v6 = vpop.eup %3448 }
 0x2f1   :  { %v642_v23 = vpop.xlane.xlu1 %641  ;;  %v4445_v39 = vpop.xlane.xlu0 %1176  ;;  %v665_v33 = vmul.f32 %v3449_v6, %v4310_v41  ;;  %v1482_v56 = vsel %vm582_vm1, %v4470_v52, -inf }
 0x2f2   :  { %3454 = vrcp.f32 %v642_v23  ;;  %v4448_v25 = vpop.eup %3450 }
 0x2f3   :  { %2820 = vmatmul.msk.f32.gmra.mxu0 %vm582_vm1, %v665_v33  ;;  %v1211_v36 = vsel %vm582_vm1, %v4448_v25, 0.0 }
 0x2f4   :  { %v4451_v5 = vpop.eup %3452 }
 0x2f5   :  { %v917_v14 = vsel %vm582_vm1, %v4451_v5, 0.0 }
 0x2f6   :  { %918 = vadd.xlane.f32.xlu0 %v917_v14 }
 0x2f7   :  { %1212 = vadd.xlane.f32.xlu1 %v1211_v36 }
 0x2f8   :  { %v3455_v45 = vpop.eup %3454 }
 0x2f9   :  { %v874_v50 = vpop.xlane.xlu0 %873  ;;  %v666_v0 = vmul.f32 %v3455_v45, %v4320_v54  ;;  %v4460_v35 = vpop.xlane.xlu1 %650 }
 0x2fa   :  { %v886_v41 = vsub.f32 %v4329_v46, %v874_v50  ;;  %v1197_v46 = vmul.f32 1.442695, %v1188_v15 }
 0x2fb   :  { %2821 = vmatmul.msk.f32.gmra.mxu0 %vm582_vm1, %v666_v0 }
 0x2fc   :  { %v899_v61 = vmul.f32 1.442695, %v886_v41 }
 0x2fe   :  { %3456 = vpow2.f32 %v899_v61 }
 0x301   :  { %v877_v4 = vpop.xlane.xlu0 %876  ;;  %v1466_v12 = vpop.xlane.xlu1 %1465 }
 0x302   :  { %v887_v11 = vsub.f32 %v4345_v17, %v877_v4  ;;  %v1486_v17 = vsub.f32 %v4342_v31, %v1466_v12  ;;  %v1189_v31 = vsub.f32 %v4283_v58, %v4427_v16 }
 0x304   :  { %v4463_v26 = vpop.eup %3456  ;;  %v901_v60 = vmul.f32 1.442695, %v887_v11  ;;  %v1495_v23 = vmul.f32 1.442695, %v1486_v17  ;;  %v1199_v50 = vmul.f32 1.442695, %v1189_v31 }
 0x305   :  { %v920_v54 = vsel %vm582_vm1, %v4463_v26, 0.0 }
 0x306   :  { %921 = vadd.xlane.f32.xlu2 %v920_v54  ;;  %3458 = vpow2.f32 %v901_v60 }
 0x309   :  { %v645_v32 = vpop.xlane.xlu0 %644  ;;  %v1472_v16 = vpop.xlane.xlu1 %1471 }
 0x30a   :  { %3460 = vrcp.f32 %v645_v32  ;;  %v1488_v60 = vsub.f32 %v4352_v20, %v1472_v16 }
 0x30b   :  { %3462 = vpow2.f32 %v1197_v46 }
 0x30c   :  { %v4473_v59 = vpop.eup %3458  ;;  %3464 = vpow2.f32 %v1495_v23  ;;  %v1499_v54 = vmul.f32 1.442695, %v1488_v60 }
 0x30d   :  { %v923_v44 = vsel %vm582_vm1, %v4473_v59, 0.0  ;;  %3466 = vpow2.f32 %v1199_v50 }
 0x30e   :  { %1483 = vmax.xlane.f32.xlu2 %v1482_v56  ;;  %924 = vadd.xlane.f32.xlu1 %v923_v44 }
 0x310   :  { %v3461_v6 = vpop.eup %3460 }
 0x311   :  { %v4479_v33 = vpop.xlane.xlu0 %1182  ;;  %v667_v14 = vmul.f32 %v3461_v6, %v4354_v7  ;;  %v4482_v36 = vpop.eup %3462  ;;  %v1190_v7 = vsub.f32 %v4296_v29, %v4430_v8 }
 0x312   :  { %v1214_v45 = vsel %vm582_vm1, %v4482_v36, 0.0  ;;  %v4489_v41 = vpop.eup %3464 }
 0x313   :  { %2822 = vmatmul.msk.f32.gmra.mxu0 %vm582_vm1, %v667_v14  ;;  %v1512_v57 = vsel %vm582_vm1, %v4489_v41, 0.0  ;;  %v1201_v58 = vmul.f32 1.442695, %v1190_v7  ;;  %v4496_v15 = vpop.eup %3466 }
 0x314   :  { %v1217_v8 = vsel %vm582_vm1, %v4496_v15, 0.0 }
 0x316   :  { %1215 = vadd.xlane.f32.xlu2 %v1214_v45 }
 0x319   :  { %v880_v0 = vpop.xlane.xlu0 %879 }
 0x31a   :  { %v888_v61 = vsub.f32 %v4369_v62, %v880_v0 }
 0x31c   :  { %v903_v4 = vmul.f32 1.442695, %v888_v61 }
 0x31e   :  { %3468 = vpow2.f32 %v903_v4  ;;  %1513 = vadd.xlane.f32.xlu2 %v1512_v57 }
 0x31f   :  { %3470 = vpow2.f32 %v1201_v58 }
 0x320   :  { %3472 = vpow2.f32 %v1499_v54 }
 0x321   :  { %v1463_v11 = vpop.xlane.xlu0 %1462 }
 0x322   :  { %v1485_v7 = vsub.f32 %v4376_v3, %v1463_v11 }
 0x323   :  { %v4499_v9 = vpop.xlane.xlu2 %1179 }
 0x324   :  { %v4501_v62 = vpop.eup %3468  ;;  %v1493_v16 = vmul.f32 1.442695, %v1485_v7 }
 0x325   :  { %v926_v29 = vsel %vm582_vm1, %v4501_v62, 0.0  ;;  %v4509_v12 = vpop.eup %3470 }
 0x326   :  { %927 = vadd.xlane.f32.xlu0 %v926_v29  ;;  %1218 = vadd.xlane.f32.xlu2 %v1217_v8  ;;  %v1220_v17 = vsel %vm582_vm1, %v4509_v12, 0.0  ;;  %v4514_v44 = vpop.eup %3472  ;;  %v1193_v8 = vsub.f32 %v4361_v34, %v4479_v33  ;;  %v1144_v33 = vpop.f32.mrf.mxu3 }
 0x327   :  { %3349 = vrot.lane.b32.xlu1 %v4011_v13, %s3798_s25 }
 0x328   :  { %v1207_v11 = vmul.f32 1.442695, %v1193_v8 }
 0x329   :  { %v1475_v46 = vpop.xlane.xlu0 %1474 }
 0x32a   :  { %v1489_v32 = vsub.f32 %v4387_v63, %v1475_v46  ;;  %v1518_v63 = vsel %vm582_vm1, %v4514_v44, 0.0 }
 0x32b   :  { %v648_v20 = vpop.xlane.xlu2 %647 }
 0x32c   :  { %3474 = vrcp.f32 %v648_v20  ;;  %v1501_v56 = vmul.f32 1.442695, %v1489_v32 }
 0x32d   :  { %3476 = vrcp.f32 %v4460_v35 }
 0x32e   :  { %1221 = vadd.xlane.f32.xlu2 %v1220_v17  ;;  %3478 = vpow2.f32 %v1501_v56  ;;  %v1191_v17 = vsub.f32 %v4318_v43, %v4445_v39  ;;  %v1154_v56 = vmul.f32 0.17677669, %v1144_v33 }
 0x331   :  { %v4516_v6 = vpop.xlane.xlu0 %1480 }
 0x332   :  { %v3475_v23 = vpop.eup %3474 }
 0x333   :  { %v654_v13 = vpop.xlane.xlu2 %653  ;;  %v668_v14 = vmul.f32 %v3475_v23, %v4389_v42  ;;  %v3477_v31 = vpop.eup %3476  ;;  %v1203_v23 = vmul.f32 1.442695, %v1191_v17 }
 0x334   :  { %3480 = vrcp.f32 %v654_v13  ;;  %v4523_v50 = vpop.eup %3478  ;;  %v669_v42 = vmul.f32 %v3477_v31, %v4331_v51  ;;  %v4558_v13 = vadd.f32 %v1154_v56, %v4213_v55 }
 0x335   :  { %2823 = vmatmul.msk.f32.gmra.mxu0 %vm582_vm1, %v668_v14  ;;  %v1521_v0 = vsel %vm582_vm1, %v4523_v50, 0.0 }
 0x336   :  { %1519 = vadd.xlane.f32.xlu2 %v1518_v63  ;;  %v1192_v63 = vsub.f32 %v4379_v47, %v4499_v9  ;;  %v1184_v43 = vsel %vm582_vm1, %v4558_v13, -inf }
 0x338   :  { %v1205_v39 = vmul.f32 1.442695, %v1192_v63 }
 0x339   :  { %v907_v45 = vpop.xlane.xlu0 %906 }
 0x33a   :  { %3482 = vrcp.f32 %v907_v45  ;;  %3344 = vrot.lane.b32.xlu0 %v4028_v21, %s3807_s22  ;;  %v3481_v61 = vpop.eup %3480 }
 0x33b   :  { %v4527_v35 = vpop.xlane.xlu2 %1468  ;;  %v670_v51 = vmul.f32 %v3481_v61, %v4399_v53 }
 0x33d   :  { %2824 = vmatmul.msk.f32.gmra.mxu0 %vm582_vm1, %v669_v42 }
 0x33e   :  { %1522 = vadd.xlane.f32.xlu2 %v1521_v0 }
 0x340   :  { %v3483_v4 = vpop.eup %3482 }
 0x341   :  { %v910_v57 = vpop.xlane.xlu0 %909  ;;  %v937_v58 = vmul.f32 %v3483_v4, %v4407_v1 }
 0x342   :  { %3484 = vrcp.f32 %v910_v57 }
 0x343   :  { %v1478_v60 = vpop.xlane.xlu2 %1477  ;;  %2842 = vmatmul.msk.f32.vlgmr.msrb.gmra.mxu2 %vm582_vm1, %v937_v58  ;;  %3486 = vpow2.f32 %v1493_v16 }
 0x344   :  { %v1490_v29 = vsub.f32 %v4419_v22, %v1478_v60 }
 0x345   :  { %2825 = vmatmul.msk.f32.gmra.mxu0 %vm582_vm1, %v670_v51 }
 0x346   :  { %v1503_v54 = vmul.f32 1.442695, %v1490_v29  ;;  %v1487_v29 = vsub.f32 %v4410_v2, %v4527_v35 }
 0x348   :  { %v3485_v3 = vpop.eup %3484  ;;  %3488 = vpow2.f32 %v1503_v54  ;;  %v1497_v8 = vmul.f32 1.442695, %v1487_v29 }
 0x349   :  { %v938_v1 = vmul.f32 %v3485_v3, %v4416_v40  ;;  %v4543_v46 = vpop.eup %3486  ;;  %3490 = vpow2.f32 %v1207_v11 }
 0x34a   :  { %v1509_v34 = vsel %vm582_vm1, %v4543_v46, 0.0 }
 0x34b   :  { %2843 = vmatmul.msk.f32.gmra.mxu2 %vm582_vm1, %v938_v1  ;;  %v1491_v1 = vsub.f32 %v4397_v30, %v4516_v6 }
 0x34e   :  { %v4545_v20 = vpop.eup %3488 }
 0x34f   :  { %v1524_v53 = vsel %vm582_vm1, %v4545_v20, 0.0  ;;  %v4551_v22 = vpop.eup %3490 }
 0x350   :  { %1525 = vadd.xlane.f32.xlu2 %v1524_v53  ;;  %v1229_v40 = vsel %vm582_vm1, %v4551_v22, 0.0 }
 0x351   :  { %1510 = vadd.xlane.f32.xlu1 %v1509_v34 }
 0x358   :  { %1230 = vadd.xlane.f32.xlu2 %v1229_v40 }
 0x359   :  { %v913_v32 = vpop.xlane.xlu0 %912 }
 0x35a   :  { %3492 = vrcp.f32 %v913_v32 }
 0x35b   :  { %3494 = vpow2.f32 %v1203_v23 }
 0x360   :  { %v3493_v14 = vpop.eup %3492 }
 0x361   :  { %v939_v31 = vmul.f32 %v3493_v14, %v4433_v10  ;;  %v4566_v42 = vpop.eup %3494 }
 0x362   :  { %v916_v45 = vpop.xlane.xlu1 %915  ;;  %v1223_v10 = vsel %vm582_vm1, %v4566_v42, 0.0 }
 0x363   :  { %3496 = vrcp.f32 %v916_v45  ;;  %2844 = vmatmul.msk.f32.gmra.mxu2 %vm582_vm1, %v939_v31 }
 0x364   :  { %1185 = vmax.xlane.f32.xlu0 %v1184_v43  ;;  %3498 = vpow2.f32 %v1205_v39 }
 0x369   :  { %v3497_v55 = vpop.eup %3496  ;;  %v919_v0 = vpop.xlane.xlu0 %918 }
 0x36a   :  { %3500 = vrcp.f32 %v919_v0  ;;  %v940_v47 = vmul.f32 %v3497_v55, %v4441_v24  ;;  %3354 = vrot.lane.b32.xlu1 %v4028_v21, %s3798_s25  ;;  %v4574_v9 = vpop.eup %3498  ;;  %v1213_v57 = vpop.xlane.xlu1 %1212 }
 0x36b   :  { %v1226_v4 = vsel %vm582_vm1, %v4574_v9, 0.0 }
 0x36c   :  { %2845 = vmatmul.msk.f32.gmra.mxu2 %vm582_vm1, %v940_v47  ;;  %1224 = vadd.xlane.f32.xlu0 %v1223_v10 }
 0x370   :  { %v3501_v61 = vpop.eup %3500 }
 0x371   :  { %v941_v7 = vmul.f32 %v3501_v61, %v4451_v5 }
 0x374   :  { %2846 = vmatmul.msk.f32.gmra.mxu2 %vm582_vm1, %v941_v7  ;;  %1227 = vadd.xlane.f32.xlu0 %v1226_v4 }
 0x379   :  { %v922_v24 = vpop.xlane.xlu2 %921 }
 0x37a   :  { %3502 = vrcp.f32 %v922_v24 }
 0x380   :  { %v3503_v21 = vpop.eup %3502 }
 0x381   :  { %v1484_v58 = vpop.xlane.xlu2 %1483  ;;  %v942_v16 = vmul.f32 %v3503_v21, %v4463_v26  ;;  %v925_v60 = vpop.xlane.xlu1 %924 }
 0x382   :  { %v1492_v51 = vsub.f32 %v4470_v52, %v1484_v58  ;;  %3504 = vrcp.f32 %v925_v60  ;;  %v1505_v52 = vmul.f32 1.442695, %v1491_v1 }
 0x383   :  { %2847 = vmatmul.msk.f32.gmra.mxu2 %vm582_vm1, %v942_v16 }
 0x384   :  { %v1507_v5 = vmul.f32 1.442695, %v1492_v51 }
 0x386   :  { %3506 = vpow2.f32 %v1507_v5 }
 0x387   :  { %3508 = vpow2.f32 %v1497_v8 }
 0x388   :  { %v3505_v54 = vpop.eup %3504  ;;  %3510 = vpow2.f32 %v1505_v52 }
 0x389   :  { %v943_v3 = vmul.f32 %v3505_v54, %v4473_v59  ;;  %v1216_v14 = vpop.xlane.xlu2 %1215 }
 0x38b   :  { %2848 = vmatmul.msk.f32.gmra.mxu2 %vm582_vm1, %v943_v3 }
 0x38c   :  { %v4588_v26 = vpop.eup %3506 }
 0x38d   :  { %v1530_v2 = vsel %vm582_vm1, %v4588_v26, 0.0  ;;  %v4593_v35 = vpop.eup %3508 }
 0x38e   :  { %1531 = vadd.xlane.f32.xlu0 %v1530_v2  ;;  %v1515_v11 = vsel %vm582_vm1, %v4593_v35, 0.0  ;;  %v4597_v59 = vpop.eup %3510 }
 0x38f   :  { %v1527_v34 = vsel %vm582_vm1, %v4597_v59, 0.0 }
 0x391   :  { %v1514_v45 = vpop.xlane.xlu2 %1513 }
 0x394   :  { %1516 = vadd.xlane.f32.xlu1 %v1515_v11 }
 0x399   :  { %v928_v30 = vpop.xlane.xlu0 %927  ;;  %v3350_v6 = vpop.permute.xlu1 %3349 }
 0x39a   :  { %3512 = vrcp.f32 %v928_v30  ;;  %v3351_v53 = vunpack.i.l.bf16 %v3350_v6  ;;  %v3352_v40 = vunpack.i.h.bf16 %v3350_v6  ;;  %v1219_v47 = vpop.xlane.xlu2 %1218 }
 0x39c   :  { %1528 = vadd.xlane.f32.xlu1 %v1527_v34  ;;  %1311 = vmatpush.msra.mxu0 %v3351_v53 }
 0x39e   :  { %1312 = vmatpush.msra.mxu0 %v3352_v40 }
 0x3a0   :  { %v3513_v33 = vpop.eup %3512 }
 0x3a1   :  { %v944_v32 = vmul.f32 %v3513_v33, %v4501_v62 }
 0x3a2   :  { %v1222_v58 = vpop.xlane.xlu2 %1221 }
 0x3a3   :  { %2849 = vmatmul.msk.f32.gmra.mxu2 %vm582_vm1, %v944_v32 }
 0x3aa   :  { %v1520_v29 = vpop.xlane.xlu2 %1519 }
 0x3ac   :  { %v3345_v17 = vpop.permute.xlu0 %3344 }
 0x3ad   :  { %v3346_v56 = vunpack.i.l.bf16 %v3345_v17  ;;  %v3347_v23 = vunpack.i.h.bf16 %v3345_v17 }
 0x3af   :  { %1611 = vmatpush.msra.mxu2 %v3346_v56 }
 0x3b1   :  { %1612 = vmatpush.msra.mxu2 %v3347_v23 }
 0x3b2   :  { %v1523_v1 = vpop.xlane.xlu2 %1522 }
 0x3c4   :  { %v1511_v63 = vpop.xlane.xlu1 %1510 }
 0x3c5   :  { %3514 = vrcp.f32 %v1511_v63 }
 0x3c6   :  { %v1018_v31 = vpop.f32.mrf.mxu2  ;;  %3516 = vrcp.f32 %v1514_v45 }
 0x3c7   :  { %3518 = vrcp.f32 %v1213_v57 }
 0x3cb   :  { %v3515_v43 = vpop.eup %3514 }
 0x3cc   :  { %v1541_v39 = vmul.f32 %v3515_v43, %v4543_v46  ;;  %v3517_v62 = vpop.eup %3516 }
 0x3cd   :  { %v1542_v10 = vmul.f32 %v3517_v62, %v4489_v41  ;;  %v3519_v46 = vpop.eup %3518 }
 0x3ce   :  { %v1021_v55 = vpop.f32.mrf.mxu2  ;;  %2890 = vmatmul.msk.f32.vlgmr.msra.gmra.mxu2 %vm582_vm1, %v1541_v39  ;;  %v1243_v60 = vmul.f32 %v3519_v46, %v4448_v25 }
 0x3cf   :  { %v3358_v0 = vpack.i.bf16 %v1021_v55, %v1018_v31  ;;  %v4641_v31 = vpop.f32.mrf.mxu0 }
 0x3d1   :  { %3359 = vrot.lane.b32.xlu2 %v3358_v0, %s3807_s22 }
 0x3d6   :  { %2891 = vmatmul.msk.f32.gmra.mxu2 %vm582_vm1, %v1542_v10 }
 0x3d7   :  { %v1186_v61 = vpop.xlane.xlu0 %1185  ;;  %v4645_v43 = vpop.f32.mrf.mxu0 }
 0x3d8   :  { %v1194_v7 = vsub.f32 %v4558_v13, %v1186_v61 }
 0x3da   :  { %v1209_v4 = vmul.f32 1.442695, %v1194_v7 }
 0x3dc   :  { %3520 = vpow2.f32 %v1209_v4  ;;  %v3355_v24 = vpop.permute.xlu1 %3354 }
 0x3dd   :  { %v3356_v21 = vunpack.i.l.bf16 %v3355_v24  ;;  %3522 = vrcp.f32 %v1216_v14  ;;  %v3357_v16 = vunpack.i.h.bf16 %v3355_v24 }
 0x3de   :  { %3524 = vrcp.f32 %v1219_v47 }
 0x3df   :  { %1313 = vmatpush.msra.mxu0 %v3356_v21  ;;  %3526 = vrcp.f32 %v1222_v58  ;;  %v1225_v2 = vpop.xlane.xlu0 %1224  ;;  %v4650_v0 = vpop.f32.mrf.mxu0 }
 0x3e0   :  { %3528 = vrcp.f32 %v1225_v2 }
 0x3e1   :  { %1314 = vmatpush.msra.mxu0 %v3357_v16 }
 0x3e2   :  { %v4610_v51 = vpop.eup %3520  ;;  %2866 = vmatmul.msk.f32.vlgmr.msra.gmra.mxu0 %vm582_vm1, %v1243_v60 }
 0x3e3   :  { %v1232_v41 = vsel %vm582_vm1, %v4610_v51, 0.0  ;;  %v3523_v13 = vpop.eup %3522 }
 0x3e4   :  { %1233 = vadd.xlane.f32.xlu1 %v1232_v41  ;;  %v1244_v5 = vmul.f32 %v3523_v13, %v4482_v36  ;;  %v3525_v8 = vpop.eup %3524  ;;  %v1526_v36 = vpop.xlane.xlu2 %1525 }
 0x3e5   :  { %v1245_v3 = vmul.f32 %v3525_v8, %v4496_v15  ;;  %v3527_v52 = vpop.eup %3526 }
 0x3e6   :  { %v4615_v57 = vpop.f32.mrf.mxu2  ;;  %v1246_v11 = vmul.f32 %v3527_v52, %v4509_v12  ;;  %v3529_v6 = vpop.eup %3528 }
 0x3e7   :  { %v1228_v30 = vpop.xlane.xlu0 %1227  ;;  %v1247_v34 = vmul.f32 %v3529_v6, %v4566_v42  ;;  %v4655_v10 = vpop.f32.mrf.mxu0 }
 0x3e8   :  { %3530 = vrcp.f32 %v1228_v30 }
 0x3ea   :  { %2867 = vmatmul.msk.f32.gmra.mxu0 %vm582_vm1, %v1244_v5 }
 0x3ec   :  { %v1231_v15 = vpop.xlane.xlu2 %1230 }
 0x3ed   :  { %3532 = vrcp.f32 %v1231_v15 }
 0x3ee   :  { %v3531_v40 = vpop.eup %3530 }
 0x3ef   :  { %v4619_v25 = vpop.f32.mrf.mxu2  ;;  %v1248_v17 = vmul.f32 %v3531_v40, %v4574_v9  ;;  %v4659_v7 = vpop.f32.mrf.mxu0  ;;  %v3214_v40 = vld [vmem:[#allocation13 + $0x20] sm:$0xff] }
 0x3f0   :  { %v3373_v54 = vpack.i.bf16 %v4619_v25, %v4615_v57  ;;  %v3217_v57 = vld [vmem:[#allocation13 + $0x38] sm:$0xff]  ;;  %v3216_v25 = vld [vmem:[#allocation13 + $0x30] sm:$0xff] }
 0x3f1   :  { %1827 = vmatpush.bf16.msra.mxu3 %v3217_v57 }
 0x3f2   :  { %2868 = vmatmul.msk.f32.gmra.mxu0 %vm582_vm1, %v1245_v3 }
 0x3f3   :  { %v3533_v56 = vpop.eup %3532 }
 0x3f4   :  { %v1249_v14 = vmul.f32 %v3533_v56, %v4551_v22 }
 0x3f5   :  { %1828 = vmatpush.bf16.msra.mxu3 %v3216_v25 }
 0x3f7   :  { %v4627_v53 = vpop.f32.mrf.mxu2  ;;  %v4661_v4 = vpop.f32.mrf.mxu0 }
 0x3fa   :  { %2869 = vmatmul.msk.f32.gmra.mxu0 %vm582_vm1, %v1246_v11 }
 0x3ff   :  { %v4663_v46 = vpop.f32.mrf.mxu0 }
 0x402   :  { %2870 = vmatmul.msk.f32.gmra.mxu0 %vm582_vm1, %v1247_v34 }
 0x406   :  { %v4631_v33 = vpop.f32.mrf.mxu2 }
 0x407   :  { %v3388_v32 = vpack.i.bf16 %v4631_v33, %v4627_v53  ;;  %v1517_v12 = vpop.xlane.xlu1 %1516  ;;  %v3215_v53 = vld [vmem:[#allocation13 + $0x28] sm:$0xff]  ;;  %v3213_v33 = vld [vmem:[#allocation13 + $0x18] sm:$0xff] }
 0x408   :  { %3534 = vrcp.f32 %v1517_v12  ;;  %1829 = vmatpush.bf16.msra.mxu3 %v3215_v53  ;;  %v3212_v12 = vld [vmem:[#allocation13 + $0x10] sm:$0xff] }
 0x409   :  { %3536 = vrcp.f32 %v1520_v29 }
 0x40a   :  { %2871 = vmatmul.msk.f32.gmra.mxu0 %vm582_vm1, %v1248_v17  ;;  %3538 = vrcp.f32 %v1523_v1  ;;  %v3211_v17 = vld [vmem:[#allocation13 + $0x8] sm:$0xff] }
 0x40b   :  { %3540 = vrcp.f32 %v1526_v36 }
 0x40c   :  { %1830 = vmatpush.bf16.msra.mxu3 %v3214_v40 }
 0x40e   :  { %v3535_v23 = vpop.eup %3534 }
 0x40f   :  { %v1543_v42 = vmul.f32 %v3535_v23, %v4593_v35  ;;  %v3537_v63 = vpop.eup %3536  ;;  %v1529_v22 = vpop.xlane.xlu1 %1528 }
 0x410   :  { %v1544_v45 = vmul.f32 %v3537_v63, %v4514_v44  ;;  %v3539_v9 = vpop.eup %3538  ;;  %3542 = vrcp.f32 %v1529_v22  ;;  %v1532_v44 = vpop.xlane.xlu0 %1531  ;;  %1831 = vmatpush.bf16.msra.mxu3 %v3213_v33 }
 0x411   :  { %2892 = vmatmul.msk.f32.gmra.mxu2 %vm582_vm1, %v1543_v42  ;;  %v1545_v35 = vmul.f32 %v3539_v9, %v4523_v50  ;;  %v3541_v39 = vpop.eup %3540  ;;  %3544 = vrcp.f32 %v1532_v44  ;;  %v3210_v42 = vld [vmem:[#allocation13] sm:$0xff] }
 0x412   :  { %2872 = vmatmul.msk.f32.gmra.mxu0 %vm582_vm1, %v1249_v14  ;;  %v1546_v55 = vmul.f32 %v3541_v39, %v4545_v20  ;;  %v1036_v20 = vpop.f32.mrf.mxu2 }
 0x414   :  { %1832 = vmatpush.bf16.msra.mxu3 %v3212_v12 }
 0x416   :  { %v3543_v62 = vpop.eup %3542 }
 0x417   :  { %v1547_v47 = vmul.f32 %v3543_v62, %v4597_v59  ;;  %v3545_v50 = vpop.eup %3544  ;;  %v4665_v59 = vpop.f32.mrf.mxu0 }
 0x418   :  { %v1548_v61 = vmul.f32 %v3545_v50, %v4588_v26  ;;  %1833 = vmatpush.bf16.msra.mxu3 %v3211_v17 }
 0x419   :  { %2893 = vmatmul.msk.f32.gmra.mxu2 %vm582_vm1, %v1544_v45 }
 0x41c   :  { %1834 = vmatpush.bf16.msra.mxu3 %v3210_v42 }
 0x421   :  { %2894 = vmatmul.msk.f32.gmra.mxu2 %vm582_vm1, %v1545_v35 }
 0x426   :  { %v1039_v24 = vpop.f32.mrf.mxu2 }
 0x427   :  { %v3403_v52 = vpack.i.bf16 %v1039_v24, %v1036_v20 }
 0x429   :  { %2895 = vmatmul.msk.f32.gmra.mxu2 %vm582_vm1, %v1546_v55 }
 0x42b   :  { %v3360_v63 = vpop.permute.xlu2 %3359 }
 0x42c   :  { %v3362_v45 = vunpack.i.h.bf16 %v3360_v63  ;;  %v3361_v9 = vunpack.i.l.bf16 %v3360_v63 }
 0x42e   :  { %v1735_v39 = vsel %vm476_vm0, %v4645_v43, %v3362_v45 }
 0x431   :  { %2896 = vmatmul.msk.f32.gmra.mxu2 %vm582_vm1, %v1547_v47  ;;  %v1734_v47 = vsel %vm476_vm0, %v4641_v31, %v3361_v9 }
 0x439   :  { %2897 = vmatmul.msk.f32.gmra.mxu2 %vm582_vm1, %v1548_v61 }
 0x451   :  { %v1614_v21 = vpop.f32.mrf.mxu2 }
 0x457   :  { %v1234_v58 = vpop.xlane.xlu1 %1233 }
 0x458   :  { %3546 = vrcp.f32 %v1234_v58 }
 0x459   :  { %v1617_v16 = vpop.f32.mrf.mxu2 }
 0x45a   :  { %v3368_v60 = vpack.i.bf16 %v1617_v16, %v1614_v21 }
 0x45c   :  { %3369 = vrot.lane.b32.xlu1 %v3368_v60, %s3806_s9 }
 0x45e   :  { %v3547_v26 = vpop.eup %3546 }
 0x45f   :  { %v1250_v41 = vmul.f32 %v3547_v26, %v4610_v51  ;;  %v1316_v13 = vpop.f32.mrf.mxu0 }
 0x461   :  { %2873 = vmatmul.msk.f32.gmra.mxu0 %vm582_vm1, %v1250_v41 }
 0x467   :  { %v1319_v29 = vpop.f32.mrf.mxu0 }
 0x468   :  { %v3363_v5 = vpack.i.bf16 %v1319_v29, %v1316_v13 }
 0x46a   :  { %3364 = vrot.lane.b32.xlu0 %v3363_v5, %s3798_s25 }
 0x46f   :  { %v1322_v8 = vpop.f32.mrf.mxu0 }
 0x472   :  { %3374 = vrot.lane.b32.xlu0 %v3373_v54, %s3807_s22 }
 0x477   :  { %v1325_v3 = vpop.f32.mrf.mxu0 }
 0x478   :  { %v3378_v1 = vpack.i.bf16 %v1325_v3, %v1322_v8 }
 0x47a   :  { %3379 = vrot.lane.b32.xlu2 %v3378_v1, %s3798_s25 }
 0x47f   :  { %v1328_v2 = vpop.f32.mrf.mxu0 }
 0x482   :  { %3389 = vrot.lane.b32.xlu2 %v3388_v32, %s3807_s22 }
 0x487   :  { %v1331_v51 = vpop.f32.mrf.mxu0 }
 0x488   :  { %v3393_v11 = vpack.i.bf16 %v1331_v51, %v1328_v2 }
 0x48a   :  { %3404 = vrot.lane.b32.xlu2 %v3403_v52, %s3807_s22  ;;  %3394 = vrot.lane.b32.xlu1 %v3393_v11, %s3798_s25 }
 0x48f   :  { %v1334_v14 = vpop.f32.mrf.mxu0 }
 0x494   :  { %v1620_v36 = vpop.f32.mrf.mxu2 }
 0x49c   :  { %v1623_v30 = vpop.f32.mrf.mxu2 }
 0x49d   :  { %v3383_v6 = vpack.i.bf16 %v1623_v30, %v1620_v36 }
 0x49f   :  { %3384 = vrot.lane.b32.xlu0 %v3383_v6, %s3806_s9 }
 0x4a4   :  { %v1626_v54 = vpop.f32.mrf.mxu2 }
 0x4ac   :  { %v1629_v34 = vpop.f32.mrf.mxu2 }
 0x4ad   :  { %v3398_v15 = vpack.i.bf16 %v1629_v34, %v1626_v54 }
 0x4af   :  { %3399 = vrot.lane.b32.xlu0 %v3398_v15, %s3806_s9 }
 0x4b4   :  { %v1632_v32 = vpop.f32.mrf.mxu2 }
 0x4bc   :  { %v1635_v56 = vpop.f32.mrf.mxu2 }
 0x4bd   :  { %v3413_v23 = vpack.i.bf16 %v1635_v56, %v1632_v32 }
 0x4bf   :  { %3414 = vrot.lane.b32.xlu0 %v3413_v23, %s3806_s9 }
 0x4ce   :  { %v3370_v35 = vpop.permute.xlu1 %3369 }
 0x4cf   :  { %v3372_v50 = vunpack.i.h.bf16 %v3370_v35  ;;  %v3371_v61 = vunpack.i.l.bf16 %v3370_v35 }
 0x4d4   :  { %v3380_v13 = vpop.permute.xlu2 %3379 }
 0x4d5   :  { %v3382_v5 = vunpack.i.h.bf16 %v3380_v13  ;;  %v3381_v8 = vunpack.i.l.bf16 %v3380_v13 }
 0x4dc   :  { %v3365_v22 = vpop.permute.xlu0 %3364  ;;  %v3390_v6 = vpop.permute.xlu2 %3389 }
 0x4dd   :  { %v3367_v55 = vunpack.i.h.bf16 %v3365_v22  ;;  %v3366_v44 = vunpack.i.l.bf16 %v3365_v22  ;;  %v3392_v57 = vunpack.i.h.bf16 %v3390_v6  ;;  %v3391_v25 = vunpack.i.l.bf16 %v3390_v6 }
 0x4de   :  { %v1337_v62 = vpop.f32.mrf.mxu0 }
 0x4df   :  { %v3408_v20 = vpack.i.bf16 %v1337_v62, %v1334_v14  ;;  %v1743_v24 = vsel %vm582_vm1, %v1735_v39, %v3367_v55  ;;  %v1742_v21 = vsel %vm582_vm1, %v1734_v47, %v3366_v44  ;;  %v1739_v34 = vsel %vm476_vm0, %v4661_v4, %v3392_v57 }
 0x4e0   :  { %v1751_v58 = vsel %vm1750_vm2, %v1742_v21, %v3371_v61  ;;  %v1752_v43 = vsel %vm1750_vm2, %v1743_v24, %v3372_v50  ;;  %v1738_v15 = vsel %vm476_vm0, %v4659_v7, %v3391_v25 }
 0x4e1   :  { %3409 = vrot.lane.b32.xlu1 %v3408_v20, %s3798_s25  ;;  %v1759_v16 = vpack.c.bf16 %v1752_v43, %v1751_v58 }
 0x4e3   :  { %1835 = vmatmul.bf16.vlgmr.msra.gmra.mxu3 %v1759_v16 }
 0x4e4   :  { %v3375_v60 = vpop.permute.xlu0 %3374  ;;  %v3405_v42 = vpop.permute.xlu2 %3404 }
 0x4e5   :  { %v3377_v26 = vunpack.i.h.bf16 %v3375_v60  ;;  %v3376_v41 = vunpack.i.l.bf16 %v3375_v60  ;;  %v3407_v14 = vunpack.i.h.bf16 %v3405_v42  ;;  %v3406_v63 = vunpack.i.l.bf16 %v3405_v42 }
 0x4e7   :  { %v1737_v31 = vsel %vm476_vm0, %v4655_v10, %v3377_v26  ;;  %v1736_v29 = vsel %vm476_vm0, %v4650_v0, %v3376_v41  ;;  %v1741_v7 = vsel %vm476_vm0, %v4665_v59, %v3407_v14  ;;  %v1740_v22 = vsel %vm476_vm0, %v4663_v46, %v3406_v63 }
 0x4e8   :  { %v1744_v51 = vsel %vm582_vm1, %v1736_v29, %v3381_v8  ;;  %v1745_v52 = vsel %vm582_vm1, %v1737_v31, %v3382_v5  ;;  %v3808_v41 = vmov 128.0  }
 0x4e9   :  { %3548 = vrcp.f32 %v3808_v41 }
 0x4ef   :  { %v3549_v13 = vpop.eup %3548 }
 0x4f0   :  { %vm1877_vm3 = vweird.f32 %v3549_v13 }
 0x4fc   :  { %v3395_v10 = vpop.permute.xlu1 %3394 }
 0x4fd   :  { %v3397_v0 = vunpack.i.h.bf16 %v3395_v10  ;;  %v3396_v54 = vunpack.i.l.bf16 %v3395_v10 }
 0x4ff   :  { %v1746_v32 = vsel %vm582_vm1, %v1738_v15, %v3396_v54  ;;  %v1747_v12 = vsel %vm582_vm1, %v1739_v34, %v3397_v0 }
 0x511   :  { %v3385_v3 = vpop.permute.xlu0 %3384 }
 0x512   :  { %v3387_v1 = vunpack.i.h.bf16 %v3385_v3  ;;  %v3386_v2 = vunpack.i.l.bf16 %v3385_v3 }
 0x514   :  { %v1753_v11 = vsel %vm1750_vm2, %v1744_v51, %v3386_v2  ;;  %v1754_v36 = vsel %vm1750_vm2, %v1745_v52, %v3387_v1 }
 0x515   :  { %v1760_v30 = vpack.c.bf16 %v1754_v36, %v1753_v11 }
 0x517   :  { %1840 = vmatmul.bf16.gmra.mxu3 %v1760_v30 }
 0x521   :  { %v3400_v53 = vpop.permute.xlu0 %3399 }
 0x522   :  { %v3402_v40 = vunpack.i.h.bf16 %v3400_v53  ;;  %v3401_v33 = vunpack.i.l.bf16 %v3400_v53 }
 0x524   :  { %v1755_v17 = vsel %vm1750_vm2, %v1746_v32, %v3401_v33  ;;  %v1756_v56 = vsel %vm1750_vm2, %v1747_v12, %v3402_v40  ;;  %v3233_v32 = vld [vmem:[#allocation14 + $0x78] sm:$0xff]  ;;  %v3232_v12 = vld [vmem:[#allocation14 + $0x70] sm:$0xff] }
 0x525   :  { %v1761_v23 = vpack.c.bf16 %v1756_v56, %v1755_v17  ;;  %2130 = vmatpush.bf16.msrb.mxu0 %v3233_v32  ;;  %v3231_v17 = vld [vmem:[#allocation14 + $0x68] sm:$0xff]  ;;  %v3230_v56 = vld [vmem:[#allocation14 + $0x60] sm:$0xff] }
 0x526   :  { %v3254_v32 = vld [vmem:[#allocation14 + $0x120] sm:$0xff] }
 0x527   :  { %1845 = vmatmul.bf16.gmra.mxu3 %v1761_v23  ;;  %v3229_v23 = vld [vmem:[#allocation14 + $0x58] sm:$0xff] }
 0x529   :  { %2131 = vmatpush.bf16.msrb.mxu0 %v3232_v12  ;;  %v3219_v12 = vld [vmem:[#allocation14 + $0x8] sm:$0xff] }
 0x52d   :  { %2132 = vmatpush.bf16.msrb.mxu0 %v3231_v17  ;;  %v3243_v17 = vld [vmem:[#allocation14 + $0xc8] sm:$0xff] }
 0x531   :  { %v3415_v45 = vpop.permute.xlu0 %3414  ;;  %2133 = vmatpush.bf16.msrb.mxu0 %v3230_v56  ;;  %v3253_v56 = vld [vmem:[#allocation14 + $0x118] sm:$0xff] }
 0x532   :  { %v3417_v39 = vunpack.i.h.bf16 %v3415_v45  ;;  %v3416_v55 = vunpack.i.l.bf16 %v3415_v45  ;;  %v3228_v45 = vld [vmem:[#allocation14 + $0x50] sm:$0xff] }
 0x535   :  { %2134 = vmatpush.bf16.msrb.mxu0 %v3229_v23 }
 0x539   :  { %2135 = vmatpush.bf16.msrb.mxu0 %v3228_v45  ;;  %v3218_v45 = vld [vmem:[#allocation14] sm:$0xff] }
 0x553   :  { %v3410_v4 = vpop.permute.xlu1 %3409 }
 0x554   :  { %v3412_v9 = vunpack.i.h.bf16 %v3410_v4  ;;  %v3411_v35 = vunpack.i.l.bf16 %v3410_v4 }
 0x556   :  { %v1748_v44 = vsel %vm582_vm1, %v1740_v22, %v3411_v35  ;;  %v1749_v62 = vsel %vm582_vm1, %v1741_v7, %v3412_v9  ;;  %v3227_v9 = vld [vmem:[#allocation14 + $0x48] sm:$0xff] }
 0x557   :  { %v1757_v47 = vsel %vm1750_vm2, %v1748_v44, %v3416_v55  ;;  %v1758_v50 = vsel %vm1750_vm2, %v1749_v62, %v3417_v39  ;;  %2136 = vmatpush.bf16.msrb.mxu0 %v3227_v9  ;;  %v3226_v55 = vld [vmem:[#allocation14 + $0x40] sm:$0xff]  ;;  %v3252_v9 = vld [vmem:[#allocation14 + $0x110] sm:$0xff] }
 0x558   :  { %v1762_v61 = vpack.c.bf16 %v1758_v50, %v1757_v47 }
 0x55a   :  { %1850 = vmatmul.bf16.gmra.mxu3 %v1762_v61  ;;  %v3241_v61 = vld [vmem:[#allocation14 + $0xb8] sm:$0xff] }
 0x55b   :  { %2137 = vmatpush.bf16.msrb.mxu0 %v3226_v55  ;;  %2270 = vmatpush.bf16.msrb.mxu2 %v3241_v61 }
 0x566   :  { %v1836_v20 = vpop.f32.mrf.mxu3 }
 0x567   :  { %v1837_v43 = vadd.f32 %v1836_v20, %v3913_v18 }
 0x56e   :  { %v1838_v24 = vpop.f32.mrf.mxu3 }
 0x56f   :  { %v1839_v21 = vadd.f32 %v1838_v24, %v3915_v19  ;;  %v1873_v19 = vmul.f32 128.0, %v3549_v13 }
 0x571   :  { %1858 = vadd.xlane.f32.xlu0 %v1839_v21  ;;  %v1874_v29 = vsub.f32 1.0, %v1873_v19  ;;  %v3224_v19 = vld [vmem:[#allocation14 + $0x30] sm:$0xff] }
 0x573   :  { %v1875_v5 = vmul.f32 %v3549_v13, %v1874_v29  ;;  %v3248_v29 = vld [vmem:[#allocation14 + $0xf0] sm:$0xff] }
 0x575   :  { %v1876_v3 = vadd.f32 %v3549_v13, %v1875_v5 }
 0x577   :  { %v4721_v18 = vsel %vm1877_vm3, %v3549_v13, %v1876_v3  ;;  %v4774_v3 = vld [vmem:[%s4818_s8] ss:$0 sm:$0xff] }
 0x59a   :  { %v1841_v59 = vpop.f32.mrf.mxu3 }
 0x59b   :  { %v1842_v46 = vadd.f32 %v1841_v59, %v3919_v27  ;;  %v3240_v59 = vld [vmem:[#allocation14 + $0xb0] sm:$0xff] }
 0x59c   :  { %2271 = vmatpush.bf16.msrb.mxu2 %v3240_v59  ;;  %v3273_v59 = vld [vmem:[#allocation14 + $0x1b8] sm:$0xff] }
 0x59d   :  { %1860 = vadd.xlane.f32.xlu2 %v1842_v46 }
 0x5a2   :  { %v1843_v58 = vpop.f32.mrf.mxu3 }
 0x5a3   :  { %v1844_v16 = vadd.f32 %v1843_v58, %v3921_v28 }
 0x5a5   :  { %1856 = vadd.xlane.f32.xlu2 %v1837_v43  ;;  %1862 = vadd.xlane.f32.xlu1 %v1844_v16 }
 0x5aa   :  { %v1846_v60 = vpop.f32.mrf.mxu3 }
 0x5ab   :  { %v1847_v26 = vadd.f32 %v1846_v60, %v3925_v37  ;;  %v3239_v60 = vld [vmem:[#allocation14 + $0xa8] sm:$0xff] }
 0x5ac   :  { %2272 = vmatpush.bf16.msrb.mxu2 %v3239_v60 }
 0x5ad   :  { %1864 = vadd.xlane.f32.xlu2 %v1847_v26 }
 0x5b2   :  { %v1848_v31 = vpop.f32.mrf.mxu3 }
 0x5b3   :  { %v1849_v37 = vadd.f32 %v1848_v31, %v3927_v38  ;;  %v3238_v31 = vld [vmem:[#allocation14 + $0xa0] sm:$0xff] }
 0x5b4   :  { %2273 = vmatpush.bf16.msrb.mxu2 %v3238_v31 }
 0x5dd   :  { %v1851_v27 = vpop.f32.mrf.mxu3 }
 0x5de   :  { %v1852_v8 = vadd.f32 %v1851_v27, %v3931_v48  ;;  %v4769_v27 = vld [vmem:[%s4817_s7] ss:$0 sm:$0xff]  ;;  %s3809_s7 = smov [#allocation16]  }
 0x5df   :  { %s2690_s8 = sshll.u32 %s3809_s7, 4  ;;  %s2691_s8 = int_to_ptr.vmem [resolvable:$true] %s2690_s8 }
 0x5e0   :  { %1868 = vadd.xlane.f32.xlu1 %v1852_v8 }
 0x5e4   :  { %v1859_v28 = vpop.xlane.xlu0 %1858 }
 0x5e5   :  { %v1853_v1 = vpop.f32.mrf.mxu3  ;;  %v1880_v2 = vmul.f32 %v4721_v18, %v1859_v28 }
 0x5e6   :  { %v1854_v51 = vadd.f32 %v1853_v1, %v3933_v49  ;;  %v3223_v1 = vld [vmem:[#allocation14 + $0x28] sm:$0xff] }
 0x5e7   :  { %v4726_v52 = vsub.f32 %v1839_v21, %v1880_v2  ;;  %v3247_v2 = vld [vmem:[#allocation14 + $0xe8] sm:$0xff] }
 0x5e8   :  { %1870 = vadd.xlane.f32.xlu0 %v1854_v51  ;;  %1866 = vadd.xlane.f32.xlu1 %v1849_v37 }
 0x5e9   :  { %v1896_v48 = vmul.f32 %v4726_v52, %v4726_v52 }
 0x5f0   :  { %1905 = vadd.xlane.f32.xlu1 %v1896_v48 }
 0x610   :  { %v1861_v11 = vpop.xlane.xlu2 %1860 }
 0x611   :  { %v1881_v36 = vmul.f32 %v4721_v18, %v1861_v11 }
 0x613   :  { %v4731_v30 = vsub.f32 %v1842_v46, %v1881_v36  ;;  %v3222_v36 = vld [vmem:[#allocation14 + $0x20] sm:$0xff] }
 0x615   :  { %v1897_v38 = vmul.f32 %v4731_v30, %v4731_v30 }
 0x617   :  { %1907 = vadd.xlane.f32.xlu0 %v1897_v38  ;;  %v3236_v38 = vld [vmem:[#allocation14 + $0x90] sm:$0xff] }
 0x618   :  { %v1857_v6 = vpop.xlane.xlu2 %1856  ;;  %v1863_v10 = vpop.xlane.xlu1 %1862 }
 0x619   :  { %v1879_v49 = vmul.f32 %v4721_v18, %v1857_v6  ;;  %v1882_v57 = vmul.f32 %v4721_v18, %v1863_v10  ;;  %v3246_v6 = vld [vmem:[#allocation14 + $0xe0] sm:$0xff]  ;;  %v3256_v10 = vld [vmem:[#allocation14 + $0x130] sm:$0xff] }
 0x61b   :  { %v4737_v25 = vsub.f32 %v1837_v43, %v1879_v49  ;;  %v4739_v0 = vsub.f32 %v1844_v16, %v1882_v57  ;;  %v3225_v16 = vld [vmem:[#allocation14 + $0x38] sm:$0xff]  ;;  %v3235_v57 = vld [vmem:[#allocation14 + $0x88] sm:$0xff] }
 0x61c   :  { %2191 = vmatpush.bf16.msrb.mxu1 %v3225_v16 }
 0x61d   :  { %v1898_v54 = vmul.f32 %v4739_v0, %v4739_v0  ;;  %v1895_v53 = vmul.f32 %v4737_v25, %v4737_v25 }
 0x61f   :  { %1909 = vadd.xlane.f32.xlu2 %v1898_v54  ;;  %1903 = vadd.xlane.f32.xlu0 %v1895_v53  ;;  %v3245_v54 = vld [vmem:[#allocation14 + $0xd8] sm:$0xff]  ;;  %v3255_v53 = vld [vmem:[#allocation14 + $0x128] sm:$0xff] }
 0x620   :  { %v1865_v34 = vpop.xlane.xlu2 %1864  ;;  %2192 = vmatpush.bf16.msrb.mxu1 %v3224_v19 }
 0x621   :  { %v1883_v15 = vmul.f32 %v4721_v18, %v1865_v34  ;;  %v3220_v34 = vld [vmem:[#allocation14 + $0x10] sm:$0xff] }
 0x623   :  { %v4746_v40 = vsub.f32 %v1847_v26, %v1883_v15  ;;  %v3249_v26 = vld [vmem:[#allocation14 + $0xf8] sm:$0xff]  ;;  %v3234_v15 = vld [vmem:[#allocation14 + $0x80] sm:$0xff] }
 0x624   :  { %2350 = vmatpush.bf16.msrb.mxu3 %v3249_v26  ;;  %2193 = vmatpush.bf16.msrb.mxu1 %v3223_v1 }
 0x625   :  { %v1899_v33 = vmul.f32 %v4746_v40, %v4746_v40 }
 0x627   :  { %1911 = vadd.xlane.f32.xlu0 %v1899_v33  ;;  %v3244_v33 = vld [vmem:[#allocation14 + $0xd0] sm:$0xff] }
 0x628   :  { %2351 = vmatpush.bf16.msrb.mxu3 %v3248_v29  ;;  %2194 = vmatpush.bf16.msrb.mxu1 %v3222_v36 }
 0x62c   :  { %2352 = vmatpush.bf16.msrb.mxu3 %v3247_v2 }
 0x630   :  { %2353 = vmatpush.bf16.msrb.mxu3 %v3246_v6 }
 0x634   :  { %2354 = vmatpush.bf16.msrb.mxu3 %v3245_v54 }
 0x638   :  { %2355 = vmatpush.bf16.msrb.mxu3 %v3244_v33 }
 0x63c   :  { %2356 = vmatpush.bf16.msrb.mxu3 %v3243_v17 }
 0x653   :  { %v1869_v42 = vpop.xlane.xlu1 %1868 }
 0x654   :  { %v1885_v14 = vmul.f32 %v4721_v18, %v1869_v42 }
 0x656   :  { %v4751_v63 = vsub.f32 %v1852_v8, %v1885_v14 }
 0x658   :  { %v1901_v4 = vmul.f32 %v4751_v63, %v4751_v63 }
 0x65a   :  { %1915 = vadd.xlane.f32.xlu2 %v1901_v4  ;;  %v3242_v4 = vld [vmem:[#allocation14 + $0xc0] sm:$0xff] }
 0x65b   :  { %v1871_v35 = vpop.xlane.xlu0 %1870  ;;  %v1867_v7 = vpop.xlane.xlu1 %1866  ;;  %2357 = vmatpush.bf16.msrb.mxu3 %v3242_v4  ;;  %v3265_v4 = vld [vmem:[#allocation14 + $0x178] sm:$0xff] }
 0x65c   :  { %v1886_v22 = vmul.f32 %v4721_v18, %v1871_v35  ;;  %v1884_v39 = vmul.f32 %v4721_v18, %v1867_v7  ;;  %v3251_v35 = vld [vmem:[#allocation14 + $0x108] sm:$0xff] }
 0x65e   :  { %v4757_v44 = vsub.f32 %v1854_v51, %v1886_v22  ;;  %v4759_v62 = vsub.f32 %v1849_v37, %v1884_v39  ;;  %v3237_v37 = vld [vmem:[#allocation14 + $0x98] sm:$0xff] }
 0x65f   :  { %v3257_v51 = vld [vmem:[#allocation14 + $0x138] sm:$0xff]  ;;  %2274 = vmatpush.bf16.msrb.mxu2 %v3237_v37 }
 0x660   :  { %v1902_v47 = vmul.f32 %v4757_v44, %v4757_v44  ;;  %v1900_v50 = vmul.f32 %v4759_v62, %v4759_v62  ;;  %2430 = vmatpush.bf16.msra.mxu0 %v3257_v51 }
 0x662   :  { %1917 = vadd.xlane.f32.xlu1 %v1902_v47  ;;  %1913 = vadd.xlane.f32.xlu2 %v1900_v50  ;;  %v3250_v47 = vld [vmem:[#allocation14 + $0x100] sm:$0xff] }
 0x663   :  { %v1906_v20 = vpop.xlane.xlu1 %1905  ;;  %2275 = vmatpush.bf16.msrb.mxu2 %v3236_v38 }
 0x664   :  { %v1920_v24 = vmul.f32 %v1906_v20, %v4721_v18  ;;  %2431 = vmatpush.bf16.msra.mxu0 %v3256_v10 }
 0x666   :  { %v1928_v21 = vadd.f32 1e-05, %v1920_v24 }
 0x667   :  { %2276 = vmatpush.bf16.msrb.mxu2 %v3235_v57 }
 0x668   :  { %3550 = vrsqrt.f32 %v1928_v21  ;;  %vm1951_vm5 = vweird.f32 %v1928_v21  ;;  %2432 = vmatpush.bf16.msra.mxu0 %v3255_v53 }
 0x66b   :  { %2277 = vmatpush.bf16.msrb.mxu2 %v3234_v15 }
 0x66c   :  { %2433 = vmatpush.bf16.msra.mxu0 %v3254_v32 }
 0x66e   :  { %v3551_v46 = vpop.eup %3550 }
 0x66f   :  { %v1946_v58 = vmul.f32 %v3551_v46, %v1928_v21  ;;  %vm1952_vm4 = vweird.f32 %v3551_v46  ;;  %2590 = vmatpush.bf16.msra.mxu2 %v3273_v59  ;;  %v3261_v59 = vld [vmem:[#allocation14 + $0x158] sm:$0xff] }
 0x670   :  { %vm1953_vm6 = vmor %vm1951_vm5, %vm1952_vm4  ;;  %2434 = vmatpush.bf16.msra.mxu0 %v3253_v56 }
 0x671   :  { %v1947_v43 = vmul.f32 %v3551_v46, %v1946_v58 }
 0x673   :  { %v1948_v41 = vmul.f32 0.5, %v1947_v43 }
 0x674   :  { %2435 = vmatpush.bf16.msra.mxu0 %v3252_v9  ;;  %v3271_v9 = vld [vmem:[#allocation14 + $0x1a8] sm:$0xff] }
 0x675   :  { %v1949_v13 = vsub.f32 1.5, %v1948_v41 }
 0x677   :  { %v1950_v5 = vmul.f32 %v3551_v46, %v1949_v13 }
 0x678   :  { %2436 = vmatpush.bf16.msra.mxu0 %v3251_v35  ;;  %v3281_v35 = vld [vmem:[#allocation14 + $0x1f8] sm:$0xff] }
 0x679   :  { %v1954_v8 = vsel %vm1953_vm6, %v3551_v46, %v1950_v5  ;;  %2670 = vmatpush.bf16.msra.mxu3 %v3281_v35 }
 0x67a   :  { %v2016_v28 = vmul.f32 %v1954_v8, %v4726_v52  ;;  %v3221_v52 = vld [vmem:[#allocation14 + $0x18] sm:$0xff] }
 0x67b   :  { %2195 = vmatpush.bf16.msrb.mxu1 %v3221_v52 }
 0x67c   :  { %v2028_v48 = vmul.f32 %v4769_v27, %v2016_v28  ;;  %2437 = vmatpush.bf16.msra.mxu0 %v3250_v47  ;;  %v3280_v47 = vld [vmem:[#allocation14 + $0x1f0] sm:$0xff] }
 0x67d   :  { %2671 = vmatpush.bf16.msra.mxu3 %v3280_v47 }
 0x67e   :  { %v2040_v11 = vadd.f32 %v4774_v3, %v2028_v48 }
 0x67f   :  { %2196 = vmatpush.bf16.msrb.mxu1 %v3220_v34 }
 0x680   :  { %v2064_v49 = vpack.c.bf16 %v2040_v11, %v2040_v11 }
 0x682   :  { %2138 = vmatmul.bf16.vlgmr.msrb.gmra.mxu0 %v2064_v49 }
 0x683   :  { %2197 = vmatpush.bf16.msrb.mxu1 %v3219_v12 }
 0x687   :  { %2198 = vmatpush.bf16.msrb.mxu1 %v3218_v45 }
 0x68a   :  { %v1908_v23 = vpop.xlane.xlu0 %1907 }
 0x68b   :  { %v1921_v42 = vmul.f32 %v1908_v23, %v4721_v18  ;;  %2510 = vmatpush.bf16.msra.mxu1 %v3265_v4 }
 0x68d   :  { %v1929_v14 = vadd.f32 1e-05, %v1921_v42 }
 0x68f   :  { %3552 = vrsqrt.f32 %v1929_v14  ;;  %vm1961_vm8 = vweird.f32 %v1929_v14 }
 0x692   :  { %v1910_v7 = vpop.xlane.xlu2 %1909  ;;  %v1904_v22 = vpop.xlane.xlu0 %1903 }
 0x693   :  { %v1922_v39 = vmul.f32 %v1910_v7, %v4721_v18  ;;  %v1919_v55 = vmul.f32 %v1904_v22, %v4721_v18 }
 0x695   :  { %v3553_v50 = vpop.eup %3552  ;;  %v1930_v61 = vadd.f32 1e-05, %v1922_v39  ;;  %v1927_v20 = vadd.f32 1e-05, %v1919_v55  ;;  %v3264_v39 = vld [vmem:[#allocation14 + $0x170] sm:$0xff]  ;;  %v3270_v55 = vld [vmem:[#allocation14 + $0x1a0] sm:$0xff] }
 0x696   :  { %v1956_v24 = vmul.f32 %v3553_v50, %v1929_v14  ;;  %vm1962_vm7 = vweird.f32 %v3553_v50  ;;  %v3272_v14 = vld [vmem:[#allocation14 + $0x1b0] sm:$0xff]  ;;  %2511 = vmatpush.bf16.msra.mxu1 %v3264_v39 }
 0x697   :  { %3554 = vrsqrt.f32 %v1930_v61  ;;  %vm1963_vm9 = vmor %vm1961_vm8, %vm1962_vm7  ;;  %vm1971_vm12 = vweird.f32 %v1930_v61  ;;  %vm1941_vm14 = vweird.f32 %v1927_v20  ;;  %2591 = vmatpush.bf16.msra.mxu2 %v3272_v14 }
 0x698   :  { %v1957_v21 = vmul.f32 %v3553_v50, %v1956_v24  ;;  %3556 = vrsqrt.f32 %v1927_v20  ;;  %v3268_v24 = vld [vmem:[#allocation14 + $0x190] sm:$0xff] }
 0x69a   :  { %v1958_v46 = vmul.f32 0.5, %v1957_v21  ;;  %v1912_v58 = vpop.xlane.xlu0 %1911  ;;  %v3278_v21 = vld [vmem:[#allocation14 + $0x1e0] sm:$0xff] }
 0x69b   :  { %v1923_v43 = vmul.f32 %v1912_v58, %v4721_v18  ;;  %2592 = vmatpush.bf16.msra.mxu2 %v3271_v9  ;;  %v3277_v58 = vld [vmem:[#allocation14 + $0x1d8] sm:$0xff] }
 0x69c   :  { %v1959_v16 = vsub.f32 1.5, %v1958_v46  ;;  %v3267_v46 = vld [vmem:[#allocation14 + $0x188] sm:$0xff] }
 0x69d   :  { %v3555_v60 = vpop.eup %3554  ;;  %v1931_v26 = vadd.f32 1e-05, %v1923_v43  ;;  %v3260_v43 = vld [vmem:[#allocation14 + $0x150] sm:$0xff] }
 0x69e   :  { %v3557_v41 = vpop.eup %3556  ;;  %v1960_v13 = vmul.f32 %v3553_v50, %v1959_v16  ;;  %v1966_v19 = vmul.f32 %v3555_v60, %v1930_v61  ;;  %vm1972_vm10 = vweird.f32 %v3555_v60  ;;  %v3279_v61 = vld [vmem:[#allocation14 + $0x1e8] sm:$0xff]  ;;  %v3266_v16 = vld [vmem:[#allocation14 + $0x180] sm:$0xff] }
 0x69f   :  { %v1936_v31 = vmul.f32 %v3557_v41, %v1927_v20  ;;  %3558 = vrsqrt.f32 %v1931_v26  ;;  %vm1942_vm11 = vweird.f32 %v3557_v41  ;;  %vm1973_vm13 = vmor %vm1971_vm12, %vm1972_vm10  ;;  %vm1981_vm1 = vweird.f32 %v1931_v26  ;;  %2593 = vmatpush.bf16.msra.mxu2 %v3270_v55  ;;  %2672 = vmatpush.bf16.msra.mxu3 %v3279_v61  ;;  %v3262_v20 = vld [vmem:[#allocation14 + $0x160] sm:$0xff] }
 0x6a0   :  { %v1964_v29 = vsel %vm1963_vm9, %v3553_v50, %v1960_v13  ;;  %v1967_v5 = vmul.f32 %v3555_v60, %v1966_v19  ;;  %vm1943_vm15 = vmor %vm1941_vm14, %vm1942_vm11  ;;  %v3269_v50 = vld [vmem:[#allocation14 + $0x198] sm:$0xff]  ;;  %v3275_v13 = vld [vmem:[#allocation14 + $0x1c8] sm:$0xff] }
 0x6a1   :  { %v2017_v8 = vmul.f32 %v1964_v29, %v4731_v30  ;;  %v1937_v28 = vmul.f32 %v3557_v41, %v1936_v31  ;;  %v3258_v31 = vld [vmem:[#allocation14 + $0x140] sm:$0xff] }
 0x6a2   :  { %v1968_v1 = vmul.f32 0.5, %v1967_v5  ;;  %v3274_v5 = vld [vmem:[#allocation14 + $0x1c0] sm:$0xff] }
 0x6a3   :  { %v2029_v37 = vmul.f32 %v4769_v27, %v2017_v8  ;;  %v1938_v2 = vmul.f32 0.5, %v1937_v28  ;;  %2594 = vmatpush.bf16.msra.mxu2 %v3269_v50  ;;  %2673 = vmatpush.bf16.msra.mxu3 %v3278_v21 }
 0x6a4   :  { %v1969_v51 = vsub.f32 1.5, %v1968_v1 }
 0x6a5   :  { %v3559_v48 = vpop.eup %3558  ;;  %v1939_v11 = vsub.f32 1.5, %v1938_v2  ;;  %v2041_v36 = vadd.f32 %v4774_v3, %v2029_v37 }
 0x6a6   :  { %v1970_v38 = vmul.f32 %v3555_v60, %v1969_v51  ;;  %v1976_v6 = vmul.f32 %v3559_v48, %v1931_v26  ;;  %vm1982_vm0 = vweird.f32 %v3559_v48 }
 0x6a7   :  { %v1940_v10 = vmul.f32 %v3557_v41, %v1939_v11  ;;  %v2204_v49 = vpack.c.bf16 %v2041_v36, %v2041_v36  ;;  %vm1983_vm2 = vmor %vm1981_vm1, %vm1982_vm0  ;;  %2595 = vmatpush.bf16.msra.mxu2 %v3268_v24  ;;  %2674 = vmatpush.bf16.msra.mxu3 %v3277_v58 }
 0x6a8   :  { %v1974_v30 = vsel %vm1973_vm13, %v3555_v60, %v1970_v38  ;;  %v1977_v52 = vmul.f32 %v3559_v48, %v1976_v6  ;;  %v3276_v60 = vld [vmem:[#allocation14 + $0x1d0] sm:$0xff] }
 0x6a9   :  { %v2018_v57 = vmul.f32 %v1974_v30, %v4739_v0  ;;  %v1944_v54 = vsel %vm1943_vm15, %v3557_v41, %v1940_v10  ;;  %2278 = vmatmul.bf16.vlgmr.msrb.gmra.mxu2 %v2204_v49  ;;  %v3259_v41 = vld [vmem:[#allocation14 + $0x148] sm:$0xff] }
 0x6aa   :  { %v2015_v53 = vmul.f32 %v1944_v54, %v4737_v25  ;;  %v1978_v34 = vmul.f32 0.5, %v1977_v52 }
 0x6ab   :  { %v2030_v15 = vmul.f32 %v4769_v27, %v2018_v57  ;;  %2596 = vmatpush.bf16.msra.mxu2 %v3267_v46  ;;  %2675 = vmatpush.bf16.msra.mxu3 %v3276_v60 }
 0x6ac   :  { %v2027_v33 = vmul.f32 %v4769_v27, %v2015_v53  ;;  %v1979_v32 = vsub.f32 1.5, %v1978_v34 }
 0x6ad   :  { %v2042_v12 = vadd.f32 %v4774_v3, %v2030_v15 }
 0x6ae   :  { %v1980_v17 = vmul.f32 %v3559_v48, %v1979_v32  ;;  %v2039_v56 = vadd.f32 %v4774_v3, %v2027_v33 }
 0x6af   :  { %v2284_v23 = vpack.c.bf16 %v2042_v12, %v2042_v12  ;;  %2597 = vmatpush.bf16.msra.mxu2 %v3266_v16  ;;  %2676 = vmatpush.bf16.msra.mxu3 %v3275_v13 }
 0x6b0   :  { %v1984_v0 = vsel %vm1983_vm2, %v3559_v48, %v1980_v17  ;;  %v2047_v42 = vpack.c.bf16 %v2039_v56, %v2039_v56 }
 0x6b1   :  { %v2019_v25 = vmul.f32 %v1984_v0, %v4746_v40  ;;  %2358 = vmatmul.bf16.vlgmr.msrb.gmra.mxu3 %v2284_v23  ;;  %v3263_v40 = vld [vmem:[#allocation14 + $0x168] sm:$0xff] }
 0x6b2   :  { %2199 = vmatmul.bf16.vlgmr.msrb.gmra.mxu1 %v2047_v42 }
 0x6b3   :  { %v2031_v45 = vmul.f32 %v4769_v27, %v2019_v25  ;;  %2512 = vmatpush.bf16.msra.mxu1 %v3263_v40  ;;  %2677 = vmatpush.bf16.msra.mxu3 %v3274_v5 }
 0x6b5   :  { %v2043_v7 = vadd.f32 %v4774_v3, %v2031_v45 }
 0x6b7   :  { %v2364_v22 = vpack.c.bf16 %v2043_v7, %v2043_v7  ;;  %2513 = vmatpush.bf16.msra.mxu1 %v3262_v20 }
 0x6b9   :  { %2438 = vmatmul.bf16.vlgmr.msra.gmra.mxu0 %v2364_v22 }
 0x6bb   :  { %2514 = vmatpush.bf16.msra.mxu1 %v3261_v59 }
 0x6bf   :  { %2515 = vmatpush.bf16.msra.mxu1 %v3260_v43 }
 0x6c3   :  { %2516 = vmatpush.bf16.msra.mxu1 %v3259_v41 }
 0x6c7   :  { %2517 = vmatpush.bf16.msra.mxu1 %v3258_v31 }
 0x6cd   :  { %v1916_v26 = vpop.xlane.xlu2 %1915 }
 0x6ce   :  { %v1925_v19 = vmul.f32 %v1916_v26, %v4721_v18 }
 0x6d0   :  { %v1933_v29 = vadd.f32 1e-05, %v1925_v19 }
 0x6d2   :  { %3560 = vrsqrt.f32 %v1933_v29  ;;  %vm2001_vm4 = vweird.f32 %v1933_v29 }
 0x6d5   :  { %v1914_v8 = vpop.xlane.xlu2 %1913  ;;  %v1918_v28 = vpop.xlane.xlu1 %1917 }
 0x6d6   :  { %v1924_v1 = vmul.f32 %v1914_v8, %v4721_v18  ;;  %v1926_v37 = vmul.f32 %v1918_v28, %v4721_v18 }
 0x6d8   :  { %v3561_v2 = vpop.eup %3560  ;;  %v1932_v51 = vadd.f32 1e-05, %v1924_v1  ;;  %v1934_v48 = vadd.f32 1e-05, %v1926_v37 }
 0x6d9   :  { %v1996_v11 = vmul.f32 %v3561_v2, %v1933_v29  ;;  %vm2002_vm3 = vweird.f32 %v3561_v2 }
 0x6da   :  { %3562 = vrsqrt.f32 %v1932_v51  ;;  %vm2003_vm5 = vmor %vm2001_vm4, %vm2002_vm3  ;;  %vm1991_vm8 = vweird.f32 %v1932_v51  ;;  %vm2011_vm10 = vweird.f32 %v1934_v48 }
 0x6db   :  { %v1997_v36 = vmul.f32 %v3561_v2, %v1996_v11  ;;  %3564 = vrsqrt.f32 %v1934_v48 }
 0x6dd   :  { %v1998_v38 = vmul.f32 0.5, %v1997_v36 }
 0x6df   :  { %v1999_v6 = vsub.f32 1.5, %v1998_v38 }
 0x6e0   :  { %v3563_v10 = vpop.eup %3562 }
 0x6e1   :  { %v3565_v49 = vpop.eup %3564  ;;  %v2000_v30 = vmul.f32 %v3561_v2, %v1999_v6  ;;  %v1986_v52 = vmul.f32 %v3563_v10, %v1932_v51  ;;  %vm1992_vm6 = vweird.f32 %v3563_v10 }
 0x6e2   :  { %v2006_v57 = vmul.f32 %v3565_v49, %v1934_v48  ;;  %vm2012_vm7 = vweird.f32 %v3565_v49  ;;  %vm1993_vm9 = vmor %vm1991_vm8, %vm1992_vm6 }
 0x6e3   :  { %v2004_v54 = vsel %vm2003_vm5, %v3561_v2, %v2000_v30  ;;  %v1987_v53 = vmul.f32 %v3563_v10, %v1986_v52  ;;  %vm2013_vm11 = vmor %vm2011_vm10, %vm2012_vm7 }
 0x6e4   :  { %v2021_v18 = vmul.f32 %v2004_v54, %v4751_v63  ;;  %v2007_v34 = vmul.f32 %v3565_v49, %v2006_v57 }
 0x6e5   :  { %v1988_v15 = vmul.f32 0.5, %v1987_v53 }
 0x6e6   :  { %v2033_v33 = vmul.f32 %v4769_v27, %v2021_v18  ;;  %v2008_v32 = vmul.f32 0.5, %v2007_v34 }
 0x6e7   :  { %v1989_v12 = vsub.f32 1.5, %v1988_v15 }
 0x6e8   :  { %v2009_v17 = vsub.f32 1.5, %v2008_v32  ;;  %v2045_v56 = vadd.f32 %v4774_v3, %v2033_v33 }
 0x6e9   :  { %v1990_v23 = vmul.f32 %v3563_v10, %v1989_v12 }
 0x6ea   :  { %v2010_v0 = vmul.f32 %v3565_v49, %v2009_v17  ;;  %v2524_v42 = vpack.c.bf16 %v2045_v56, %v2045_v56 }
 0x6eb   :  { %v1994_v14 = vsel %vm1993_vm9, %v3563_v10, %v1990_v23 }
 0x6ec   :  { %v2020_v63 = vmul.f32 %v1994_v14, %v4759_v62  ;;  %v2014_v25 = vsel %vm2013_vm11, %v3565_v49, %v2010_v0  ;;  %2598 = vmatmul.bf16.vlgmr.msra.gmra.mxu2 %v2524_v42 }
 0x6ed   :  { %v2022_v45 = vmul.f32 %v2014_v25, %v4757_v44 }
 0x6ee   :  { %v2032_v4 = vmul.f32 %v4769_v27, %v2020_v63 }
 0x6ef   :  { %v2034_v9 = vmul.f32 %v4769_v27, %v2022_v45 }
 0x6f0   :  { %v2044_v35 = vadd.f32 %v4774_v3, %v2032_v4 }
 0x6f1   :  { %v2046_v7 = vadd.f32 %v4774_v3, %v2034_v9 }
 0x6f2   :  { %v2444_v22 = vpack.c.bf16 %v2044_v35, %v2044_v35 }
 0x6f3   :  { %v2604_v39 = vpack.c.bf16 %v2046_v7, %v2046_v7 }
 0x6f4   :  { %2518 = vmatmul.bf16.vlgmr.msra.gmra.mxu1 %v2444_v22 }
 0x6f5   :  { %2678 = vmatmul.bf16.vlgmr.msra.gmra.mxu3 %v2604_v39 }
 0x6ff   :  { %v2139_v55 = vpop.f32.mrf.mxu0 }
 0x707   :  { %v2141_v47 = vpop.f32.mrf.mxu0 }
 0x72c   :  { %v2279_v40 = vpop.f32.mrf.mxu2 }
 0x72f   :  { %v2200_v62 = vpop.f32.mrf.mxu1 }
 0x730   :  { %v2201_v50 = vadd.f32 %v2200_v62, %v2139_v55 }
 0x732   :  { %v2283_v61 = vadd.f32 %v2279_v40, %v2201_v50 }
 0x734   :  { %v2281_v20 = vpop.f32.mrf.mxu2  ;;  %v2359_v44 = vpop.f32.mrf.mxu3 }
 0x735   :  { %v2363_v46 = vadd.f32 %v2359_v44, %v2283_v61 }
 0x736   :  { %v2439_v24 = vpop.f32.mrf.mxu0 }
 0x737   :  { %v2202_v21 = vpop.f32.mrf.mxu1  ;;  %v2443_v43 = vadd.f32 %v2439_v24, %v2363_v46 }
 0x73c   :  { %v2361_v59 = vpop.f32.mrf.mxu3 }
 0x73e   :  { %v2441_v27 = vpop.f32.mrf.mxu0 }
 0x76f   :  { %v2599_v58 = vpop.f32.mrf.mxu2 }
 0x771   :  { %v2519_v3 = vpop.f32.mrf.mxu1 }
 0x772   :  { %v2523_v16 = vadd.f32 %v2519_v3, %v2443_v43 }
 0x774   :  { %v2603_v26 = vadd.f32 %v2599_v58, %v2523_v16 }
 0x777   :  { %v2601_v60 = vpop.f32.mrf.mxu2 }
 0x778   :  { %v2679_v41 = vpop.f32.mrf.mxu3 }
 0x779   :  { %v2683_v13 = vadd.f32 %v2679_v41, %v2603_v26  ;;  %v2521_v19 = vpop.f32.mrf.mxu1 }
 0x77b   :  { %2684 = vst [vmem:[#allocation16] sm:$0xff] %v2683_v13 }
 0x77c   :  { %2695 = dma.vmem_to_hbm [thread:$0]  %s2691_s8, 128, %s2693_s15, [#allocation4]  }
 0x780   :  { %v2681_v31 = vpop.f32.mrf.mxu3 }
 0x781   :  { %3792 = dma.done.wait [#allocation4], 128  }
 0x782   :  { %3793 = vsyncadd [#allocation4], 4294967168 }
 0x783   :  { %2700 = vsyncpa [#allocation3], 1 }
 0x784   :  { %2701 = vsyncpa [#allocation6], 1 }
 0x785   :  { %2702 = vsyncpa [#allocation9], 1 }
 0x786   :  { %2703 = vsyncpa [#allocation12], 1 }
 0x787   :  { %2704 = vsyncpa [#allocation15], 1 }
 0x788   :  { %2705 = vsyncpa [#allocation4], 1 }

</bundles_post_ra>
